<compile_context>
chip_gen: v5e
topology: v5e:2x2
jax: 0.10.0
libtpu: 0.0.40
codegen_flags: <defaults>
</compile_context>

<pallas_src>
import functools

import jax
import jax.numpy as jnp
from jax.experimental import pallas as pl
from jax.experimental.pallas import tpu as pltpu


def decoder_kernel(x_ref, w1_ref, b1_ref, w2_ref, b2_ref, out_ref):
    # ----- Linear(z_dim, hidden) + ReLU -----
    x = x_ref[...].astype(jnp.bfloat16)  # no-op if x is already bf16
    h = jnp.dot(x, w1_ref[...], preferred_element_type=jnp.float32)
    h = jnp.maximum(h + b1_ref[...], 0.0)

    # ----- Linear(hidden, output) + sigmoid -----
    logits = jnp.dot(h.astype(jnp.bfloat16), w2_ref[...],
                     preferred_element_type=jnp.float32)
    logits = logits + b2_ref[...]
    # sigmoid(x) = 0.5 * tanh(0.5 x) + 0.5  -> one EUP op, result in [0, 1].
    out_ref[...] = (0.5 * jnp.tanh(0.5 * logits) + 0.5).astype(out_ref.dtype)


def _pick_block_b(B, max_block=1024):
    """Largest batch tile: whole batch if small, else biggest pow2 divisor."""
    if B <= max_block:
        return B
    cand = max_block
    while cand >= 8:
        if B % cand == 0:
            return cand
        cand //= 2
    return B  # fall back to a single block


@functools.partial(jax.jit, static_argnames=("block_b", "out_dtype"))
def decoder_forward(x, w1, b1, w2, b2, *, block_b=None, out_dtype=jnp.float32):
    """Decoder forward: x [B, Z] -> predicted [B, D]."""
    B, Z = x.shape
    H = w1.shape[1]
    D = w2.shape[1]

    if block_b is None:
        block_b = _pick_block_b(B)
    assert B % block_b == 0, "batch must be a multiple of the batch tile"

    grid = (B // block_b,)

    grid_spec = pltpu.PrefetchScalarGridSpec(
        num_scalar_prefetch=0,
        grid=grid,
        in_specs=[
            # activations: tiled over batch (auto double-buffered when grid>1)
            pl.BlockSpec((block_b, Z), lambda i: (i, 0)),
            # weights / biases: constant index_map -> VMEM-resident
            pl.BlockSpec((Z, H), lambda i: (0, 0)),
            pl.BlockSpec((1, H), lambda i: (0, 0)),
            pl.BlockSpec((H, D), lambda i: (0, 0)),
            pl.BlockSpec((1, D), lambda i: (0, 0)),
        ],
        out_specs=pl.BlockSpec((block_b, D), lambda i: (i, 0)),
    )

    flops = 2 * B * (Z * H + H * D)
    transcendentals = B * D  # one tanh per output element
    bytes_accessed = (x.size * x.dtype.itemsize
                      + w1.size * w1.dtype.itemsize + b1.size * b1.dtype.itemsize
                      + w2.size * w2.dtype.itemsize + b2.size * b2.dtype.itemsize
                      + B * D * jnp.dtype(out_dtype).itemsize)

    return pl.pallas_call(
        decoder_kernel,
        out_shape=jax.ShapeDtypeStruct((B, D), out_dtype),
        grid_spec=grid_spec,
        compiler_params=pltpu.CompilerParams(
            dimension_semantics=("parallel",),
        ),
        cost_estimate=pl.CostEstimate(
            flops=flops,
            transcendentals=transcendentals,
            bytes_accessed=bytes_accessed,
        ),
    )(x, w1, b1, w2, b2)


def decoder_reference(x, w1, b1, w2, b2):
    """Pure-JAX reference with the same bf16-matmul / f32-epilogue recipe."""
    h = jnp.dot(x.astype(jnp.bfloat16), w1, preferred_element_type=jnp.float32)
    h = jnp.maximum(h + b1, 0.0)
    logits = jnp.dot(h.astype(jnp.bfloat16), w2,
                     preferred_element_type=jnp.float32) + b2
    return jax.nn.sigmoid(logits)


def init_params(key, z_dim, hidden_dim, output_dim):
    """Deterministic synthetic parameters (PyTorch Linear shapes, transposed)."""
    k1, k2, k3, k4 = jax.random.split(key, 4)
    scale = 0.1
    return {
        # Linear(z_dim, hidden_dim): weight stored as [in, out] in bf16
        "w1": (scale * jax.random.normal(k1, (z_dim, hidden_dim), jnp.float32)
               ).astype(jnp.bfloat16),
        "b1": scale * jax.random.normal(k2, (1, hidden_dim), jnp.float32),
        # Linear(hidden_dim, output_dim)
        "w2": (scale * jax.random.normal(k3, (hidden_dim, output_dim),
                                         jnp.float32)).astype(jnp.bfloat16),
        "b2": scale * jax.random.normal(k4, (1, output_dim), jnp.float32),
    }


if __name__ == "__main__":
    # Lane-dense small shapes: batch, latent, hidden, output dims.
    B, Z, H, D = 256, 128, 256, 512

    key = jax.random.PRNGKey(0)
    k_x, k_p = jax.random.split(key)

    x = jax.random.normal(k_x, (B, Z), jnp.float32)
    params = init_params(k_p, Z, H, D)

    # block_b=None -> whole batch in one grid step (no per-step overhead).
    predicted = decoder_forward(x, params["w1"], params["b1"],
                                params["w2"], params["b2"])
    predicted = jax.block_until_ready(predicted)

    # shape / range sanity checks (tanh-based sigmoid guarantees [0, 1])
    assert predicted.shape == (B, D)
    assert bool(jnp.all(jnp.isfinite(predicted)))
    assert bool(jnp.all(predicted >= 0.0)) and bool(jnp.all(predicted <= 1.0))

    # numeric check vs. pure-JAX reference (bf16 matmuls -> loose tol)
    ref = decoder_reference(x, params["w1"], params["b1"],
                            params["w2"], params["b2"])
    assert bool(jnp.max(jnp.abs(predicted - ref)) < 5e-2)

    print("KERNEL_OK")
</pallas_src>

<mosaic_0001>
module attributes {stable_mosaic.version = 11 : i64} {
  func.func @decoder_kernel(%arg0: i32, %arg1: memref<256x128xf32, #tpu.memory_space<vmem>>, %arg2: memref<128x256xbf16, #tpu.memory_space<vmem>>, %arg3: memref<1x256xf32, #tpu.memory_space<vmem>>, %arg4: memref<256x512xbf16, #tpu.memory_space<vmem>>, %arg5: memref<1x512xf32, #tpu.memory_space<vmem>>, %arg6: memref<256x512xf32, #tpu.memory_space<vmem>>) attributes {dimension_semantics = [#tpu.dimension_semantics<parallel>], iteration_bounds = array<i64: 1>, scalar_prefetch = 0 : i64, scratch_operands = 0 : i64, tpu.core_type = #tpu.core_type<tc>, window_params = [{transform_indices = @transform_0, window_bounds = array<i64: 256, 128>}, {pipeline_mode = #tpu.pipeline_mode<synchronous>, transform_indices = @transform_1, window_bounds = array<i64: 128, 256>}, {pipeline_mode = #tpu.pipeline_mode<synchronous>, transform_indices = @transform_2, window_bounds = array<i64: 1, 256>}, {pipeline_mode = #tpu.pipeline_mode<synchronous>, transform_indices = @transform_3, window_bounds = array<i64: 256, 512>}, {pipeline_mode = #tpu.pipeline_mode<synchronous>, transform_indices = @transform_4, window_bounds = array<i64: 1, 512>}, {transform_indices = @transform_5, window_bounds = array<i64: 256, 512>}]} {
    %c0 = arith.constant 0 : index
    %c0_0 = arith.constant 0 : index
    %0 = vector.load %arg1[%c0, %c0_0] : memref<256x128xf32, #tpu.memory_space<vmem>>, vector<256x128xf32>
    %1 = arith.truncf %0 : vector<256x128xf32> to vector<256x128xbf16>
    %c0_1 = arith.constant 0 : index
    %c0_2 = arith.constant 0 : index
    %2 = vector.load %arg2[%c0_1, %c0_2] : memref<128x256xbf16, #tpu.memory_space<vmem>>, vector<128x256xbf16>
    %cst = arith.constant dense<0.000000e+00> : vector<256x256xf32>
    %3 = tpu.matmul %1, %2, %cst {dimension_numbers = #tpu.dot_dimension_numbers<[1], [0], [0], [1], [0, 0, 1, 1], [], []>} : vector<256x128xbf16>, vector<128x256xbf16>, vector<256x256xf32> -> vector<256x256xf32>
    %c0_3 = arith.constant 0 : index
    %c0_4 = arith.constant 0 : index
    %4 = vector.load %arg3[%c0_3, %c0_4] : memref<1x256xf32, #tpu.memory_space<vmem>>, vector<1x256xf32>
    %5 = vector.broadcast %4 : vector<1x256xf32> to vector<256x256xf32>
    %6 = arith.addf %3, %5 : vector<256x256xf32>
    %cst_5 = arith.constant 0.000000e+00 : f32
    %7 = vector.broadcast %cst_5 : f32 to vector<256x256xf32>
    %8 = arith.maximumf %6, %7 : vector<256x256xf32>
    %9 = arith.truncf %8 : vector<256x256xf32> to vector<256x256xbf16>
    %c0_6 = arith.constant 0 : index
    %c0_7 = arith.constant 0 : index
    %10 = vector.load %arg4[%c0_6, %c0_7] : memref<256x512xbf16, #tpu.memory_space<vmem>>, vector<256x512xbf16>
    %cst_8 = arith.constant dense<0.000000e+00> : vector<256x512xf32>
    %11 = tpu.matmul %9, %10, %cst_8 {dimension_numbers = #tpu.dot_dimension_numbers<[1], [0], [0], [1], [0, 0, 1, 1], [], []>} : vector<256x256xbf16>, vector<256x512xbf16>, vector<256x512xf32> -> vector<256x512xf32>
    %c0_9 = arith.constant 0 : index
    %c0_10 = arith.constant 0 : index
    %12 = vector.load %arg5[%c0_9, %c0_10] : memref<1x512xf32, #tpu.memory_space<vmem>>, vector<1x512xf32>
    %13 = vector.broadcast %12 : vector<1x512xf32> to vector<256x512xf32>
    %14 = arith.addf %11, %13 : vector<256x512xf32>
    %cst_11 = arith.constant 5.000000e-01 : f32
    %15 = vector.broadcast %cst_11 : f32 to vector<256x512xf32>
    %16 = arith.mulf %15, %14 : vector<256x512xf32>
    %17 = math.tanh %16 : vector<256x512xf32>
    %cst_12 = arith.constant 5.000000e-01 : f32
    %18 = vector.broadcast %cst_12 : f32 to vector<256x512xf32>
    %19 = arith.mulf %18, %17 : vector<256x512xf32>
    %cst_13 = arith.constant 5.000000e-01 : f32
    %20 = vector.broadcast %cst_13 : f32 to vector<256x512xf32>
    %21 = arith.addf %19, %20 : vector<256x512xf32>
    %c0_14 = arith.constant 0 : index
    %c0_15 = arith.constant 0 : index
    %22 = vector.load %arg6[%c0_14, %c0_15] : memref<256x512xf32, #tpu.memory_space<vmem>>, vector<256x512xf32>
    tpu.vector_store %arg6[%c0_14, %c0_15], %21 {strides = array<i32>} : memref<256x512xf32, #tpu.memory_space<vmem>>, vector<256x512xf32>,
    return
  }
  func.func @transform_0(%arg0: i32) -> (i32, i32) {
    %c0_i32 = arith.constant 0 : i32
    %c0_i32_0 = arith.constant 0 : i32
    return %arg0, %c0_i32 : i32, i32
  }
  func.func @transform_1(%arg0: i32) -> (i32, i32) {
    %c0_i32 = arith.constant 0 : i32
    %c0_i32_0 = arith.constant 0 : i32
    %c0_i32_1 = arith.constant 0 : i32
    return %c0_i32, %c0_i32_0 : i32, i32
  }
  func.func @transform_2(%arg0: i32) -> (i32, i32) {
    %c0_i32 = arith.constant 0 : i32
    %c0_i32_0 = arith.constant 0 : i32
    %c0_i32_1 = arith.constant 0 : i32
    return %c0_i32, %c0_i32_0 : i32, i32
  }
  func.func @transform_3(%arg0: i32) -> (i32, i32) {
    %c0_i32 = arith.constant 0 : i32
    %c0_i32_0 = arith.constant 0 : i32
    %c0_i32_1 = arith.constant 0 : i32
    return %c0_i32, %c0_i32_0 : i32, i32
  }
  func.func @transform_4(%arg0: i32) -> (i32, i32) {
    %c0_i32 = arith.constant 0 : i32
    %c0_i32_0 = arith.constant 0 : i32
    %c0_i32_1 = arith.constant 0 : i32
    return %c0_i32, %c0_i32_0 : i32, i32
  }
  func.func @transform_5(%arg0: i32) -> (i32, i32) {
    %c0_i32 = arith.constant 0 : i32
    %c0_i32_0 = arith.constant 0 : i32
    return %arg0, %c0_i32 : i32, i32
  }
}

</mosaic_0001>

<bundles_post_ra>
// kernel: decoder_forward.1
= control target key start
LH: loop header
LB: loop body
LE: loop exit
PB: predicated region body
PF: predicated region fallthrough
CT: control target
= control target key end

     0   :  { %10 = vsyncpa [#allocation3], 0  ;;  %s3579_s0 = inlined_call_operand.hbm [shape: f32[256,128], index: 0, kind: input, shape index: {}]   ;;  %s3580_s1 = inlined_call_operand.hbm [shape: bf16[128,256], index: 1, kind: input, shape index: {}]   ;;  %s3581_s2 = inlined_call_operand.hbm [shape: f32[1,256], index: 2, kind: input, shape index: {}]   ;;  %s3582_s3 = inlined_call_operand.hbm [shape: bf16[256,512], index: 3, kind: input, shape index: {}]   ;;  %s3583_s4 = inlined_call_operand.hbm [shape: f32[1,512], index: 4, kind: input, shape index: {}]   ;;  %s3584_s5 = inlined_call_operand.hbm [shape: f32[256,512], index: 5, kind: output, shape index: {}]  }
   0x1   :  { %11 = vsyncpa [#allocation6], 0 }
   0x2   :  { %12 = vsyncpa [#allocation9], 0 }
   0x3   :  { %13 = vsyncpa [#allocation4], 0  ;;  %s31_s20 = sshll.u32 %s3580_s1, 4  ;;  %s3123_s21 = smov [#allocation5]   ;;  %s32_s20 = int_to_ptr.hbm [resolvable:$true] %s31_s20 }
   0x4   :  { %s33_s22 = sshll.u32 %s3123_s21, 4  ;;  %s55_s25 = sshll.u32 %s3582_s3, 4  ;;  %s34_s22 = int_to_ptr.vmem [resolvable:$true] %s33_s22  ;;  %s56_s25 = int_to_ptr.hbm [resolvable:$true] %s55_s25 }
   0x5   :  { %s3124_s26 = smov 128   ;;  %s3125_s27 = smov 8  }
   0x6   :  { %39 = dma.hbm_to_vmem [thread:$0]  %s32_s20, 2048, %s34_s22, [#allocation6], %s3124_s26, %s3124_s26, %s3125_s27  }
   0x7   :  { %s3126_s28 = smov [#allocation8]   ;;  %s3127_s30 = smov 256  }
   0x8   :  { %s57_s29 = sshll.u32 %s3126_s28, 4  ;;  %s3128_s6 = smov 16   ;;  %s58_s29 = int_to_ptr.vmem [resolvable:$true] %s57_s29 }
   0x9   :  { %63 = dma.hbm_to_vmem [thread:$0]  %s56_s25, 8192, %s58_s29, [#allocation9], %s3127_s30, %s3127_s30, %s3128_s6  }
   0xa   :  { %s18_s8 = sshll.u32 %s3579_s0, 4  ;;  %s3129_s9 = smov [#allocation2]   ;;  %s19_s8 = int_to_ptr.hbm [resolvable:$true] %s18_s8 }
   0xb   :  { %s20_s10 = sshll.u32 %s3129_s9, 4  ;;  %s45_s12 = sshll.u32 %s3581_s2, 4  ;;  %s21_s10 = int_to_ptr.vmem [resolvable:$true] %s20_s10  ;;  %s46_s12 = int_to_ptr.hbm [resolvable:$true] %s45_s12 }
   0xc   :  { %26 = dma.hbm_to_vmem [thread:$0]  %s19_s8, 4096, %s21_s10, [#allocation3], %s3124_s26, %s3124_s26, %s3125_s27  }
   0xd   :  { %s3130_s13 = smov [#allocation7]   ;;  %s69_s17 = sshll.u32 %s3583_s4, 4  ;;  %s70_s17 = int_to_ptr.hbm [resolvable:$true] %s69_s17 }
   0xe   :  { %s47_s14 = sshll.u32 %s3130_s13, 4  ;;  %s3131_s0 = smov [#allocation10]   ;;  %s48_s14 = int_to_ptr.vmem [resolvable:$true] %s47_s14 }
   0xf   :  { %50 = dma.hbm_to_vmem [thread:$0]  %s46_s12, 32, %s48_s14, [#allocation6]  }
  0x10   :  { %s71_s18 = sshll.u32 %s3131_s0, 4  ;;  %s72_s18 = int_to_ptr.vmem [resolvable:$true] %s71_s18 }
  0x11   :  { %74 = dma.hbm_to_vmem [thread:$0]  %s70_s17, 64, %s72_s18, [#allocation9]  }
  0x12   :  { %3115 = dma.done.wait [#allocation3], 4096  }
  0x13   :  { %3116 = vsyncadd [#allocation3], 4294963200 }
  0x14   :  { %3117 = dma.done.wait [#allocation6], 2080  }
  0x15   :  { %3118 = vsyncadd [#allocation6], 4294965216 }
  0x16   :  { %3119 = dma.done.wait [#allocation9], 8256  }
  0x17   :  { %3120 = vsyncadd [#allocation9], 4294959040  ;;  %v2344_v0 = vld [vmem:[#allocation5 + $0x70] sm:$0xf]  ;;  %v2621_v1 = vld [vmem:[#allocation5 + $0x74] sm:$0xf0] }
  0x18   :  { %v2620_v2 = vld [vmem:[#allocation5 + $0x74] sm:$0xf]  ;;  %v2345_v3 = vor.u32 %v2621_v1, %v2344_v0  ;;  %v2346_v4 = vld [vmem:[#allocation5 + $0x78] sm:$0xf0]  ;;  %v2336_v5 = vld [vmem:[#allocation5 + $0x60] sm:$0xf] }
  0x19   :  { %v2619_v6 = vld [vmem:[#allocation5 + $0x64] sm:$0xf0]  ;;  %v2349_v7 = vor.u32 %v2620_v2, %v2346_v4  ;;  %v2618_v8 = vld [vmem:[#allocation5 + $0x64] sm:$0xf]  ;;  %v2338_v9 = vld [vmem:[#allocation5 + $0x68] sm:$0xf0] }
  0x1a   :  { %245 = vmatpush.bf16.msra.mxu0 %v2345_v3  ;;  %2686 = vmatpush.bf16.msra.mxu2 %v2345_v3  ;;  %v2337_v10 = vor.u32 %v2619_v6, %v2336_v5  ;;  %v2341_v11 = vor.u32 %v2618_v8, %v2338_v9  ;;  %v2328_v12 = vld [vmem:[#allocation5 + $0x50] sm:$0xf]  ;;  %v2617_v13 = vld [vmem:[#allocation5 + $0x54] sm:$0xf0]  ;;  %v2616_v14 = vld [vmem:[#allocation5 + $0x54] sm:$0xf] }
  0x1b   :  { %334 = vmatpush.bf16.msra.mxu1 %v2349_v7  ;;  %2694 = vmatpush.bf16.msra.mxu3 %v2349_v7  ;;  %v2330_v15 = vld [vmem:[#allocation5 + $0x58] sm:$0xf0]  ;;  %v2329_v16 = vor.u32 %v2617_v13, %v2328_v12  ;;  %v2320_v18 = vld [vmem:[#allocation5 + $0x40] sm:$0xf]  ;;  %v2615_v19 = vld [vmem:[#allocation5 + $0x44] sm:$0xf0] }
  0x1c   :  { %v2333_v17 = vor.u32 %v2616_v14, %v2330_v15  ;;  %v2614_v20 = vld [vmem:[#allocation5 + $0x44] sm:$0xf]  ;;  %v2322_v21 = vld [vmem:[#allocation5 + $0x48] sm:$0xf0]  ;;  %v2321_v22 = vor.u32 %v2615_v19, %v2320_v18  ;;  %v2312_v24 = vld [vmem:[#allocation5 + $0x30] sm:$0xf] }
  0x1d   :  { %v2325_v23 = vor.u32 %v2614_v20, %v2322_v21  ;;  %v2613_v25 = vld [vmem:[#allocation5 + $0x34] sm:$0xf0]  ;;  %v2612_v26 = vld [vmem:[#allocation5 + $0x34] sm:$0xf]  ;;  %v2314_v27 = vld [vmem:[#allocation5 + $0x38] sm:$0xf0] }
  0x1e   :  { %246 = vmatpush.bf16.msra.mxu0 %v2337_v10  ;;  %2687 = vmatpush.bf16.msra.mxu2 %v2337_v10  ;;  %v2313_v28 = vor.u32 %v2613_v25, %v2312_v24  ;;  %v2317_v29 = vor.u32 %v2612_v26, %v2314_v27  ;;  %v2304_v30 = vld [vmem:[#allocation5 + $0x20] sm:$0xf]  ;;  %v2611_v31 = vld [vmem:[#allocation5 + $0x24] sm:$0xf0]  ;;  %v2610_v32 = vld [vmem:[#allocation5 + $0x24] sm:$0xf] }
  0x1f   :  { %335 = vmatpush.bf16.msra.mxu1 %v2341_v11  ;;  %2695 = vmatpush.bf16.msra.mxu3 %v2341_v11  ;;  %v2306_v33 = vld [vmem:[#allocation5 + $0x28] sm:$0xf0]  ;;  %v2305_v34 = vor.u32 %v2611_v31, %v2304_v30  ;;  %v2296_v36 = vld [vmem:[#allocation5 + $0x10] sm:$0xf]  ;;  %v2609_v37 = vld [vmem:[#allocation5 + $0x14] sm:$0xf0] }
  0x20   :  { %v2309_v35 = vor.u32 %v2610_v32, %v2306_v33  ;;  %v2608_v38 = vld [vmem:[#allocation5 + $0x14] sm:$0xf]  ;;  %v2298_v39 = vld [vmem:[#allocation5 + $0x18] sm:$0xf0]  ;;  %v2297_v40 = vor.u32 %v2609_v37, %v2296_v36  ;;  %v2288_v42 = vld [vmem:[#allocation5] sm:$0xf] }
  0x21   :  { %v2301_v41 = vor.u32 %v2608_v38, %v2298_v39  ;;  %v2607_v43 = vld [vmem:[#allocation5 + $0x4] sm:$0xf0]  ;;  %v2606_v44 = vld [vmem:[#allocation5 + $0x4] sm:$0xf]  ;;  %v2290_v45 = vld [vmem:[#allocation5 + $0x8] sm:$0xf0] }
  0x22   :  { %247 = vmatpush.bf16.msra.mxu0 %v2329_v16  ;;  %2688 = vmatpush.bf16.msra.mxu2 %v2329_v16  ;;  %v95_v46 = vld [vmem:[#allocation2] sm:$0xff]  ;;  %v2652_v48 = vld [vmem:[#allocation8 + $0xec] sm:$0xf0]  ;;  %v2289_v51 = vor.u32 %v2607_v43, %v2288_v42  ;;  %v96_v52 = vld [vmem:[#allocation2 + $0x8] sm:$0xff]  ;;  %v2293_v55 = vor.u32 %v2606_v44, %v2290_v45  ;;  %s3132_s2 = smov [#allocation11]   ;;  %s2271_s21 = sshll.u32 %s3584_s5, 4  ;;  %s2272_s21 = int_to_ptr.hbm [resolvable:$true] %s2271_s21 }
  0x23   :  { %336 = vmatpush.bf16.msra.mxu1 %v2333_v17  ;;  %2696 = vmatpush.bf16.msra.mxu3 %v2333_v17  ;;  %v2464_v47 = vld [vmem:[#allocation8 + $0xe0] sm:$0xf]  ;;  %v2684_v50 = vld [vmem:[#allocation8 + $0x1ec] sm:$0xf0]  ;;  %v112_v54 = vld [vmem:[#allocation2 + $0x88] sm:$0xff]  ;;  %v127_v63 = vpack.c.bf16 %v96_v52, %v95_v46  ;;  %s2269_s4 = sshll.u32 %s3132_s2, 4  ;;  %s2270_s4 = int_to_ptr.vmem [resolvable:$true] %s2269_s4 }
  0x24   :  { %v2592_v49 = vld [vmem:[#allocation8 + $0x1e0] sm:$0xf]  ;;  %v2650_v56 = vld [vmem:[#allocation8 + $0xe4] sm:$0xf]  ;;  %v2466_v57 = vld [vmem:[#allocation8 + $0xf0] sm:$0xf0]  ;;  %v2465_v58 = vor.u32 %v2652_v48, %v2464_v47 }
  0x25   :  { %v111_v53 = vld [vmem:[#allocation2 + $0x80] sm:$0xff]  ;;  %v2593_v59 = vor.u32 %v2684_v50, %v2592_v49  ;;  %v2594_v61 = vld [vmem:[#allocation8 + $0x1f0] sm:$0xf0]  ;;  %v2648_v1 = vld [vmem:[#allocation8 + $0xcc] sm:$0xf0]  ;;  %v2469_v4 = vor.u32 %v2650_v56, %v2466_v57  ;;  %s3133_s22 = smov 512  }
  0x26   :  { %248 = vmatpush.bf16.msra.mxu0 %v2321_v22  ;;  %2689 = vmatpush.bf16.msra.mxu2 %v2321_v22  ;;  %v2682_v60 = vld [vmem:[#allocation8 + $0x1e4] sm:$0xf]  ;;  %v2448_v62 = vld [vmem:[#allocation8 + $0xc0] sm:$0xf]  ;;  %v135_v0 = vpack.c.bf16 %v112_v54, %v111_v53  ;;  %v2680_v3 = vld [vmem:[#allocation8 + $0x1cc] sm:$0xf0] }
  0x27   :  { %337 = vmatpush.bf16.msra.mxu1 %v2325_v23  ;;  %2697 = vmatpush.bf16.msra.mxu3 %v2325_v23  ;;  %v2576_v2 = vld [vmem:[#allocation8 + $0x1c0] sm:$0xf]  ;;  %v2597_v5 = vor.u32 %v2682_v60, %v2594_v61  ;;  %v2449_v6 = vor.u32 %v2648_v1, %v2448_v62  ;;  %v2646_v8 = vld [vmem:[#allocation8 + $0xc4] sm:$0xf]  ;;  %v2450_v9 = vld [vmem:[#allocation8 + $0xd0] sm:$0xf0] }
  0x28   :  { %v2577_v7 = vor.u32 %v2680_v3, %v2576_v2  ;;  %v2453_v10 = vor.u32 %v2646_v8, %v2450_v9  ;;  %v2678_v11 = vld [vmem:[#allocation8 + $0x1c4] sm:$0xf]  ;;  %v2578_v12 = vld [vmem:[#allocation8 + $0x1d0] sm:$0xf0]  ;;  %v2432_v14 = vld [vmem:[#allocation8 + $0xa0] sm:$0xf] }
  0x29   :  { %v2581_v13 = vor.u32 %v2678_v11, %v2578_v12  ;;  %v2644_v15 = vld [vmem:[#allocation8 + $0xac] sm:$0xf0]  ;;  %v2560_v16 = vld [vmem:[#allocation8 + $0x1a0] sm:$0xf]  ;;  %v98_v21 = vld [vmem:[#allocation2 + $0x18] sm:$0xff]  ;;  %s3134_s23 = smov 32  }
  0x2a   :  { %249 = vmatpush.bf16.msra.mxu0 %v2313_v28  ;;  %2690 = vmatpush.bf16.msra.mxu2 %v2313_v28  ;;  %v2433_v17 = vor.u32 %v2644_v15, %v2432_v14  ;;  %v2676_v18 = vld [vmem:[#allocation8 + $0x1ac] sm:$0xf0]  ;;  %v114_v23 = vld [vmem:[#allocation2 + $0x98] sm:$0xff]  ;;  %v2642_v26 = vld [vmem:[#allocation8 + $0xa4] sm:$0xf] }
  0x2b   :  { %338 = vmatpush.bf16.msra.mxu1 %v2317_v29  ;;  %2698 = vmatpush.bf16.msra.mxu3 %v2317_v29  ;;  %v2561_v19 = vor.u32 %v2676_v18, %v2560_v16  ;;  %v97_v20 = vld [vmem:[#allocation2 + $0x10] sm:$0xff]  ;;  %v2674_v29 = vld [vmem:[#allocation8 + $0x1a4] sm:$0xf]  ;;  %v2416_v32 = vld [vmem:[#allocation8 + $0x80] sm:$0xf] }
  0x2c   :  { %v113_v22 = vld [vmem:[#allocation2 + $0x90] sm:$0xff]  ;;  %v128_v24 = vpack.c.bf16 %v98_v21, %v97_v20  ;;  %v99_v38 = vld [vmem:[#allocation2 + $0x20] sm:$0xff]  ;;  %v100_v39 = vld [vmem:[#allocation2 + $0x28] sm:$0xff] }
  0x2d   :  { %v136_v25 = vpack.c.bf16 %v114_v23, %v113_v22  ;;  %v2434_v27 = vld [vmem:[#allocation8 + $0xb0] sm:$0xf0]  ;;  %v2640_v33 = vld [vmem:[#allocation8 + $0x8c] sm:$0xf0]  ;;  %v129_v42 = vpack.c.bf16 %v100_v39, %v99_v38  ;;  %v2638_v44 = vld [vmem:[#allocation8 + $0x84] sm:$0xf] }
  0x2e   :  { %250 = vmatpush.bf16.msra.mxu0 %v2305_v34  ;;  %2691 = vmatpush.bf16.msra.mxu2 %v2305_v34  ;;  %v2437_v28 = vor.u32 %v2642_v26, %v2434_v27  ;;  %v2562_v30 = vld [vmem:[#allocation8 + $0x1b0] sm:$0xf0]  ;;  %v2544_v34 = vld [vmem:[#allocation8 + $0x180] sm:$0xf]  ;;  %v2672_v36 = vld [vmem:[#allocation8 + $0x18c] sm:$0xf0] }
  0x2f   :  { %339 = vmatpush.bf16.msra.mxu1 %v2309_v35  ;;  %2699 = vmatpush.bf16.msra.mxu3 %v2309_v35  ;;  %v2565_v31 = vor.u32 %v2674_v29, %v2562_v30  ;;  %v2417_v35 = vor.u32 %v2640_v33, %v2416_v32  ;;  %v2545_v37 = vor.u32 %v2672_v36, %v2544_v34  ;;  %v2418_v45 = vld [vmem:[#allocation8 + $0x90] sm:$0xf0]  ;;  %v2670_v47 = vld [vmem:[#allocation8 + $0x184] sm:$0xf]  ;;  %v2400_v50 = vld [vmem:[#allocation8 + $0x60] sm:$0xf] }
  0x30   :  { %v2421_v46 = vor.u32 %v2638_v44, %v2418_v45  ;;  %v2546_v48 = vld [vmem:[#allocation8 + $0x190] sm:$0xf0]  ;;  %v2528_v52 = vld [vmem:[#allocation8 + $0x160] sm:$0xf]  ;;  %v2668_v54 = vld [vmem:[#allocation8 + $0x16c] sm:$0xf0] }
  0x31   :  { %v2549_v49 = vor.u32 %v2670_v47, %v2546_v48  ;;  %v101_v56 = vld [vmem:[#allocation2 + $0x30] sm:$0xff]  ;;  %v102_v57 = vld [vmem:[#allocation2 + $0x38] sm:$0xff]  ;;  %v2634_v62 = vld [vmem:[#allocation8 + $0x64] sm:$0xf] }
  0x32   :  { %251 = vmatpush.bf16.msra.mxu0 %v2297_v40  ;;  %2692 = vmatpush.bf16.msra.mxu2 %v2297_v40  ;;  %v115_v40 = vld [vmem:[#allocation2 + $0xa0] sm:$0xff]  ;;  %v130_v60 = vpack.c.bf16 %v102_v57, %v101_v56  ;;  %v2530_v2 = vld [vmem:[#allocation8 + $0x170] sm:$0xf0]  ;;  %v2664_v8 = vld [vmem:[#allocation8 + $0x14c] sm:$0xf0] }
  0x33   :  { %340 = vmatpush.bf16.msra.mxu1 %v2301_v41  ;;  %2700 = vmatpush.bf16.msra.mxu3 %v2301_v41  ;;  %v116_v41 = vld [vmem:[#allocation2 + $0xa8] sm:$0xff]  ;;  %v119_v12 = vld [vmem:[#allocation2 + $0xc0] sm:$0xff]  ;;  %v2514_v20 = vld [vmem:[#allocation8 + $0x150] sm:$0xf0] }
  0x34   :  { %v137_v43 = vpack.c.bf16 %v116_v41, %v115_v40  ;;  %v2666_v1 = vld [vmem:[#allocation8 + $0x164] sm:$0xf]  ;;  %v2368_v22 = vld [vmem:[#allocation8 + $0x20] sm:$0xf]  ;;  %v2628_v23 = vld [vmem:[#allocation8 + $0x2c] sm:$0xf0] }
  0x35   :  { %v2533_v3 = vor.u32 %v2666_v1, %v2530_v2  ;;  %v104_v11 = vld [vmem:[#allocation2 + $0x48] sm:$0xff]  ;;  %v2660_v26 = vld [vmem:[#allocation8 + $0x12c] sm:$0xf0]  ;;  %v106_v29 = vld [vmem:[#allocation2 + $0x58] sm:$0xff] }
  0x36   :  { %252 = vmatpush.bf16.msra.mxu0 %v2289_v51  ;;  %2693 = vmatpush.bf16.msra.mxu2 %v2289_v51  ;;  %v2636_v51 = vld [vmem:[#allocation8 + $0x6c] sm:$0xf0]  ;;  %v2630_v16 = vld [vmem:[#allocation8 + $0x44] sm:$0xf]  ;;  %v2498_v38 = vld [vmem:[#allocation8 + $0x130] sm:$0xf0] }
  0x37   :  { %341 = vmatpush.bf16.msra.mxu1 %v2293_v55  ;;  %2701 = vmatpush.bf16.msra.mxu3 %v2293_v55  ;;  %v2401_v53 = vor.u32 %v2636_v51, %v2400_v50  ;;  %v2529_v55 = vor.u32 %v2668_v54, %v2528_v52  ;;  %v121_v30 = vld [vmem:[#allocation2 + $0xd0] sm:$0xff]  ;;  %v2626_v34 = vld [vmem:[#allocation8 + $0x24] sm:$0xf]  ;;  %v2352_v40 = vld [vmem:[#allocation8] sm:$0xf] }
  0x38   :  { %v2624_v41 = vld [vmem:[#allocation8 + $0xc] sm:$0xf0]  ;;  %v108_v44 = vld [vmem:[#allocation2 + $0x68] sm:$0xff]  ;;  %v123_v45 = vld [vmem:[#allocation2 + $0xe0] sm:$0xff] }
  0x39   :  { %253 = vmatmul.bf16.vlgmr.msra.gmra.mxu0 %v127_v63  ;;  %293 = vmatmul.bf16.vlgmr.msra.gmra.mxu2 %v135_v0  ;;  %v2656_v50 = vld [vmem:[#allocation8 + $0x10c] sm:$0xf0]  ;;  %v2622_v51 = vld [vmem:[#allocation8 + $0x4] sm:$0xf]  ;;  %v2653_v1 = vld [vmem:[#allocation8 + $0xf4] sm:$0xf0] }
  0x3a   :  { %913 = vmatpush.bf16.msrb.mxu2 %v2465_v58  ;;  %342 = vmatmul.bf16.vlgmr.msra.gmra.mxu1 %v127_v63  ;;  %v117_v58 = vld [vmem:[#allocation2 + $0xb0] sm:$0xff]  ;;  %v2654_v54 = vld [vmem:[#allocation8 + $0x104] sm:$0xf] }
  0x3b   :  { %1002 = vmatpush.bf16.msrb.mxu3 %v2593_v59  ;;  %1091 = vmatpush.bf16.msrb.mxu0 %v2469_v4  ;;  %v118_v59 = vld [vmem:[#allocation2 + $0xb8] sm:$0xff]  ;;  %v2384_v4 = vld [vmem:[#allocation8 + $0x40] sm:$0xf] }
  0x3c   :  { %382 = vmatmul.bf16.vlgmr.msra.gmra.mxu3 %v135_v0  ;;  %1180 = vmatpush.bf16.msrb.mxu1 %v2597_v5  ;;  %v138_v61 = vpack.c.bf16 %v118_v59, %v117_v58  ;;  %v2402_v63 = vld [vmem:[#allocation8 + $0x70] sm:$0xf0]  ;;  %v2632_v5 = vld [vmem:[#allocation8 + $0x4c] sm:$0xf0] }
  0x3d   :  { %v2405_v0 = vor.u32 %v2634_v62, %v2402_v63  ;;  %v109_v58 = vld [vmem:[#allocation2 + $0x70] sm:$0xff]  ;;  %v110_v59 = vld [vmem:[#allocation2 + $0x78] sm:$0xff] }
  0x3e   :  { %914 = vmatpush.bf16.msrb.mxu2 %v2449_v6  ;;  %v2512_v6 = vld [vmem:[#allocation8 + $0x140] sm:$0xf]  ;;  %v134_v62 = vpack.c.bf16 %v110_v59, %v109_v58 }
  0x3f   :  { %1003 = vmatpush.bf16.msrb.mxu3 %v2577_v7  ;;  %1092 = vmatpush.bf16.msrb.mxu0 %v2453_v10  ;;  %v2385_v7 = vor.u32 %v2632_v5, %v2384_v4  ;;  %v2513_v9 = vor.u32 %v2664_v8, %v2512_v6  ;;  %v103_v10 = vld [vmem:[#allocation2 + $0x40] sm:$0xff]  ;;  %v2685_v4 = vld [vmem:[#allocation8 + $0x1f4] sm:$0xf0]  ;;  %v2651_v5 = vld [vmem:[#allocation8 + $0xec] sm:$0xf] }
  0x40   :  { %1181 = vmatpush.bf16.msrb.mxu1 %v2581_v13  ;;  %v120_v13 = vld [vmem:[#allocation2 + $0xc8] sm:$0xff]  ;;  %v131_v14 = vpack.c.bf16 %v104_v11, %v103_v10 }
  0x41   :  { %v139_v15 = vpack.c.bf16 %v120_v13, %v119_v12  ;;  %v2683_v8 = vld [vmem:[#allocation8 + $0x1ec] sm:$0xf]  ;;  %v159_v12 = vld [vmem:[#allocation7] sm:$0x3] }
  0x42   :  { %915 = vmatpush.bf16.msrb.mxu2 %v2433_v17  ;;  %v2386_v17 = vld [vmem:[#allocation8 + $0x50] sm:$0xf0] }
  0x43   :  { %1004 = vmatpush.bf16.msrb.mxu3 %v2561_v19  ;;  %1093 = vmatpush.bf16.msrb.mxu0 %v2437_v28  ;;  %v2389_v18 = vor.u32 %v2630_v16, %v2386_v17  ;;  %v2662_v19 = vld [vmem:[#allocation8 + $0x144] sm:$0xf]  ;;  %v105_v28 = vld [vmem:[#allocation2 + $0x50] sm:$0xff]  ;;  %v3182_v16 = vperm.slane %v159_v12, 1 }
  0x44   :  { %1182 = vmatpush.bf16.msrb.mxu1 %v2565_v31  ;;  %v2517_v21 = vor.u32 %v2662_v19, %v2514_v20  ;;  %v122_v31 = vld [vmem:[#allocation2 + $0xd8] sm:$0xff]  ;;  %v132_v32 = vpack.c.bf16 %v106_v29, %v105_v28 }
  0x45   :  { %v140_v33 = vpack.c.bf16 %v122_v31, %v121_v30 }
  0x46   :  { %916 = vmatpush.bf16.msrb.mxu2 %v2417_v35  ;;  %v2370_v35 = vld [vmem:[#allocation8 + $0x30] sm:$0xf0] }
  0x47   :  { %1005 = vmatpush.bf16.msrb.mxu3 %v2545_v37  ;;  %1094 = vmatpush.bf16.msrb.mxu0 %v2421_v46  ;;  %v2373_v36 = vor.u32 %v2626_v34, %v2370_v35  ;;  %v2658_v37 = vld [vmem:[#allocation8 + $0x124] sm:$0xf] }
  0x48   :  { %1183 = vmatpush.bf16.msrb.mxu1 %v2549_v49  ;;  %v2501_v39 = vor.u32 %v2658_v37, %v2498_v38  ;;  %v124_v46 = vld [vmem:[#allocation2 + $0xe8] sm:$0xff]  ;;  %v2480_v49 = vld [vmem:[#allocation8 + $0x100] sm:$0xf] }
  0x49   :  { %258 = vmatmul.bf16.gmra.mxu0 %v128_v24  ;;  %298 = vmatmul.bf16.gmra.mxu2 %v136_v25  ;;  %v141_v48 = vpack.c.bf16 %v124_v46, %v123_v45  ;;  %v2481_v52 = vor.u32 %v2656_v50, %v2480_v49  ;;  %v2681_v49 = vld [vmem:[#allocation8 + $0x1d4] sm:$0xf0] }
  0x4a   :  { %347 = vmatmul.bf16.gmra.mxu1 %v128_v24  ;;  %917 = vmatpush.bf16.msrb.mxu2 %v2401_v53  ;;  %v2496_v24 = vld [vmem:[#allocation8 + $0x120] sm:$0xf]  ;;  %v2354_v53 = vld [vmem:[#allocation8 + $0x10] sm:$0xf0] }
  0x4b   :  { %1006 = vmatpush.bf16.msrb.mxu3 %v2529_v55  ;;  %1095 = vmatpush.bf16.msrb.mxu0 %v2405_v0  ;;  %v2497_v27 = vor.u32 %v2660_v26, %v2496_v24  ;;  %v2482_v55 = vld [vmem:[#allocation8 + $0x110] sm:$0xf0]  ;;  %v2357_v56 = vor.u32 %v2622_v51, %v2354_v53  ;;  %v2472_v0 = vld [vmem:[#allocation8 + $0xe8] sm:$0xf]  ;;  %v2647_v51 = vld [vmem:[#allocation8 + $0xcc] sm:$0xf] }
  0x4c   :  { %387 = vmatmul.bf16.gmra.mxu3 %v136_v25  ;;  %1184 = vmatpush.bf16.msrb.mxu1 %v2533_v3  ;;  %v2369_v25 = vor.u32 %v2628_v23, %v2368_v22  ;;  %v2485_v57 = vor.u32 %v2654_v54, %v2482_v55  ;;  %v2473_v2 = vor.u32 %v2653_v1, %v2472_v0  ;;  %v2600_v3 = vld [vmem:[#allocation8 + $0x1e8] sm:$0xf]  ;;  %v2679_v53 = vld [vmem:[#allocation8 + $0x1cc] sm:$0xf] }
  0x4d   :  { %v2601_v6 = vor.u32 %v2685_v4, %v2600_v3 }
  0x4e   :  { %918 = vmatpush.bf16.msrb.mxu2 %v2385_v7  ;;  %v2474_v7 = vld [vmem:[#allocation8 + $0xf8] sm:$0xf0] }
  0x4f   :  { %1007 = vmatpush.bf16.msrb.mxu3 %v2513_v9  ;;  %1096 = vmatpush.bf16.msrb.mxu0 %v2389_v18  ;;  %v2602_v9 = vld [vmem:[#allocation8 + $0x1f8] sm:$0xf0]  ;;  %v2477_v10 = vor.u32 %v2651_v5, %v2474_v7 }
  0x50   :  { %1185 = vmatpush.bf16.msrb.mxu1 %v2517_v21  ;;  %v2605_v11 = vor.u32 %v2683_v8, %v2602_v9 }
  0x52   :  { %919 = vmatpush.bf16.msrb.mxu2 %v2369_v25 }
  0x53   :  { %1008 = vmatpush.bf16.msrb.mxu3 %v2497_v27  ;;  %1097 = vmatpush.bf16.msrb.mxu0 %v2373_v36 }
  0x54   :  { %1186 = vmatpush.bf16.msrb.mxu1 %v2501_v39 }
  0x57   :  { %1009 = vmatpush.bf16.msrb.mxu3 %v2481_v52  ;;  %1098 = vmatpush.bf16.msrb.mxu0 %v2357_v56  ;;  %v2458_v52 = vld [vmem:[#allocation8 + $0xd8] sm:$0xf0] }
  0x58   :  { %1187 = vmatpush.bf16.msrb.mxu1 %v2485_v57  ;;  %v2461_v55 = vor.u32 %v2647_v51, %v2458_v52  ;;  %v2586_v56 = vld [vmem:[#allocation8 + $0x1d8] sm:$0xf0]  ;;  %v2645_v51 = vld [vmem:[#allocation8 + $0xb4] sm:$0xf0] }
  0x59   :  { %263 = vmatmul.bf16.gmra.mxu0 %v129_v42  ;;  %303 = vmatmul.bf16.gmra.mxu2 %v137_v43  ;;  %v2589_v59 = vor.u32 %v2679_v53, %v2586_v56 }
  0x5a   :  { %352 = vmatmul.bf16.gmra.mxu1 %v129_v42  ;;  %v2353_v42 = vor.u32 %v2624_v41, %v2352_v40  ;;  %v2456_v40 = vld [vmem:[#allocation8 + $0xc8] sm:$0xf]  ;;  %v2649_v41 = vld [vmem:[#allocation8 + $0xd4] sm:$0xf0] }
  0x5b   :  { %1358 = vmatpush.bf16.msra.mxu3 %v2601_v6  ;;  %1447 = vmatpush.bf16.msra.mxu0 %v2477_v10 }
  0x5c   :  { %392 = vmatmul.bf16.gmra.mxu3 %v137_v43  ;;  %920 = vmatpush.bf16.msrb.mxu2 %v2353_v42  ;;  %v107_v43 = vld [vmem:[#allocation2 + $0x60] sm:$0xff] }
  0x5d   :  { %v133_v47 = vpack.c.bf16 %v108_v44, %v107_v43  ;;  %1536 = vmatpush.bf16.msra.mxu1 %v2605_v11  ;;  %v2457_v44 = vor.u32 %v2649_v41, %v2456_v40 }
  0x5f   :  { %1448 = vmatpush.bf16.msra.mxu0 %v2461_v55 }
  0x60   :  { %1269 = vmatpush.bf16.msra.mxu2 %v2473_v2 }
  0x61   :  { %1537 = vmatpush.bf16.msra.mxu1 %v2589_v59  ;;  %v2677_v59 = vld [vmem:[#allocation8 + $0x1b4] sm:$0xf0] }
  0x64   :  { %1270 = vmatpush.bf16.msra.mxu2 %v2457_v44 }
  0x69   :  { %268 = vmatmul.bf16.gmra.mxu0 %v130_v60  ;;  %308 = vmatmul.bf16.gmra.mxu2 %v138_v61 }
  0x6a   :  { %357 = vmatmul.bf16.gmra.mxu1 %v130_v60  ;;  %v125_v60 = vld [vmem:[#allocation2 + $0xf0] sm:$0xff] }
  0x6c   :  { %397 = vmatmul.bf16.gmra.mxu3 %v138_v61  ;;  %v126_v61 = vld [vmem:[#allocation2 + $0xf8] sm:$0xff] }
  0x6d   :  { %v142_v63 = vpack.c.bf16 %v126_v61, %v125_v60 }
  0x79   :  { %273 = vmatmul.bf16.gmra.mxu0 %v131_v14  ;;  %313 = vmatmul.bf16.gmra.mxu2 %v139_v15 }
  0x7a   :  { %362 = vmatmul.bf16.gmra.mxu1 %v131_v14 }
  0x7c   :  { %402 = vmatmul.bf16.gmra.mxu3 %v139_v15  ;;  %v3180_v15 = vperm.slane %v159_v12, 0 }
  0x89   :  { %278 = vmatmul.bf16.gmra.mxu0 %v132_v32  ;;  %318 = vmatmul.bf16.gmra.mxu2 %v140_v33 }
  0x8a   :  { %367 = vmatmul.bf16.gmra.mxu1 %v132_v32 }
  0x8c   :  { %407 = vmatmul.bf16.gmra.mxu3 %v140_v33 }
  0x99   :  { %283 = vmatmul.bf16.gmra.mxu0 %v133_v47  ;;  %323 = vmatmul.bf16.gmra.mxu2 %v141_v48 }
  0x9a   :  { %372 = vmatmul.bf16.gmra.mxu1 %v133_v47 }
  0x9c   :  { %412 = vmatmul.bf16.gmra.mxu3 %v141_v48  ;;  %v2584_v48 = vld [vmem:[#allocation8 + $0x1c8] sm:$0xf] }
  0x9d   :  { %v2585_v50 = vor.u32 %v2681_v49, %v2584_v48 }
  0x9f   :  { %1359 = vmatpush.bf16.msra.mxu3 %v2585_v50  ;;  %v2440_v50 = vld [vmem:[#allocation8 + $0xa8] sm:$0xf] }
  0xa9   :  { %288 = vmatmul.bf16.gmra.mxu0 %v134_v62  ;;  %328 = vmatmul.bf16.gmra.mxu2 %v142_v63 }
  0xaa   :  { %377 = vmatmul.bf16.gmra.mxu1 %v134_v62 }
  0xac   :  { %417 = vmatmul.bf16.gmra.mxu3 %v142_v63 }
  0xb6   :  { %v254_v13 = vpop.f32.mrf.mxu0 }
  0xb7   :  { %v343_v14 = vpop.f32.mrf.mxu1  ;;  %v255_v18 = vadd.f32 %v254_v13, %v3180_v15 }
  0xb8   :  { %v344_v20 = vadd.f32 %v343_v14, %v3182_v16 }
  0xb9   :  { %v423_v25 = vmax.f32 %v255_v18, 0.0 }
  0xba   :  { %v424_v28 = vmax.f32 %v344_v20, 0.0 }
  0xbc   :  { %v294_v17 = vpop.f32.mrf.mxu2 }
  0xbd   :  { %v295_v27 = vadd.f32 %v294_v17, %v3180_v15 }
  0xbe   :  { %v256_v21 = vpop.f32.mrf.mxu0 }
  0xbf   :  { %v383_v19 = vpop.f32.mrf.mxu3  ;;  %v257_v22 = vadd.f32 %v256_v21, %v3180_v15  ;;  %v345_v23 = vpop.f32.mrf.mxu1  ;;  %v455_v34 = vmax.f32 %v295_v27, 0.0 }
  0xc0   :  { %v346_v24 = vadd.f32 %v345_v23, %v3182_v16  ;;  %v384_v30 = vadd.f32 %v383_v19, %v3182_v16 }
  0xc1   :  { %v425_v26 = vmax.f32 %v257_v22, 0.0 }
  0xc2   :  { %v426_v29 = vmax.f32 %v346_v24, 0.0  ;;  %v456_v37 = vmax.f32 %v384_v30, 0.0 }
  0xc3   :  { %v3190_v31 = vpack.c.bf16 %v425_v26, %v423_v25 }
  0xc4   :  { %v3192_v32 = vpack.c.bf16 %v426_v29, %v424_v28  ;;  %v296_v33 = vpop.f32.mrf.mxu2 }
  0xc5   :  { %921 = vmatmul.bf16.vlgmr.msrb.gmra.mxu2 %v3190_v31  ;;  %1099 = vmatmul.bf16.vlgmr.msrb.gmra.mxu0 %v3190_v31  ;;  %v297_v35 = vadd.f32 %v296_v33, %v3180_v15 }
  0xc6   :  { %1010 = vmatmul.bf16.vlgmr.msrb.gmra.mxu3 %v3192_v32  ;;  %1188 = vmatmul.bf16.vlgmr.msrb.gmra.mxu1 %v3192_v32  ;;  %v259_v38 = vpop.f32.mrf.mxu0 }
  0xc7   :  { %v385_v36 = vpop.f32.mrf.mxu3  ;;  %v348_v42 = vpop.f32.mrf.mxu1  ;;  %v457_v43 = vmax.f32 %v297_v35, 0.0  ;;  %v260_v57 = vadd.f32 %v259_v38, %v3180_v15 }
  0xc8   :  { %v386_v39 = vadd.f32 %v385_v36, %v3182_v16  ;;  %v349_v60 = vadd.f32 %v348_v42, %v3182_v16 }
  0xc9   :  { %v3200_v46 = vpack.c.bf16 %v457_v43, %v455_v34  ;;  %v427_v1 = vmax.f32 %v260_v57, 0.0 }
  0xca   :  { %v458_v45 = vmax.f32 %v386_v39, 0.0  ;;  %v428_v4 = vmax.f32 %v349_v60, 0.0 }
  0xcc   :  { %v3202_v47 = vpack.c.bf16 %v458_v45, %v456_v37  ;;  %v299_v54 = vpop.f32.mrf.mxu2 }
  0xcd   :  { %v300_v3 = vadd.f32 %v299_v54, %v3180_v15  ;;  %v2441_v54 = vor.u32 %v2645_v51, %v2440_v50 }
  0xce   :  { %v261_v61 = vpop.f32.mrf.mxu0 }
  0xcf   :  { %v388_v58 = vpop.f32.mrf.mxu3  ;;  %v262_v62 = vadd.f32 %v261_v61, %v3180_v15  ;;  %v350_v63 = vpop.f32.mrf.mxu1  ;;  %v459_v10 = vmax.f32 %v300_v3, 0.0  ;;  %1271 = vmatpush.bf16.msra.mxu2 %v2441_v54  ;;  %v2643_v61 = vld [vmem:[#allocation8 + $0xac] sm:$0xf] }
  0xd0   :  { %v351_v0 = vadd.f32 %v350_v63, %v3182_v16  ;;  %v389_v6 = vadd.f32 %v388_v58, %v3182_v16  ;;  %v2568_v58 = vld [vmem:[#allocation8 + $0x1a8] sm:$0xf]  ;;  %v2675_v63 = vld [vmem:[#allocation8 + $0x1ac] sm:$0xf] }
  0xd1   :  { %v429_v2 = vmax.f32 %v262_v62, 0.0  ;;  %v2569_v60 = vor.u32 %v2677_v59, %v2568_v58  ;;  %v2442_v62 = vld [vmem:[#allocation8 + $0xb8] sm:$0xf0] }
  0xd2   :  { %v430_v5 = vmax.f32 %v351_v0, 0.0  ;;  %v460_v13 = vmax.f32 %v389_v6, 0.0 }
  0xd3   :  { %v3210_v7 = vpack.c.bf16 %v429_v2, %v427_v1  ;;  %v2445_v1 = vor.u32 %v2643_v61, %v2442_v62  ;;  %v2570_v2 = vld [vmem:[#allocation8 + $0x1b8] sm:$0xf0]  ;;  %1360 = vmatpush.bf16.msra.mxu3 %v2569_v60 }
  0xd4   :  { %v3212_v8 = vpack.c.bf16 %v430_v5, %v428_v4  ;;  %v301_v9 = vpop.f32.mrf.mxu2  ;;  %v2573_v5 = vor.u32 %v2675_v63, %v2570_v2 }
  0xd5   :  { %926 = vmatmul.bf16.gmra.mxu2 %v3210_v7  ;;  %1104 = vmatmul.bf16.gmra.mxu0 %v3210_v7  ;;  %v302_v11 = vadd.f32 %v301_v9, %v3180_v15 }
  0xd6   :  { %1015 = vmatmul.bf16.gmra.mxu3 %v3212_v8  ;;  %1193 = vmatmul.bf16.gmra.mxu1 %v3212_v8  ;;  %v264_v14 = vpop.f32.mrf.mxu0 }
  0xd7   :  { %v390_v12 = vpop.f32.mrf.mxu3  ;;  %v353_v18 = vpop.f32.mrf.mxu1  ;;  %v461_v19 = vmax.f32 %v302_v11, 0.0  ;;  %v265_v24 = vadd.f32 %v264_v14, %v3180_v15  ;;  %1449 = vmatpush.bf16.msra.mxu0 %v2445_v1  ;;  %1538 = vmatpush.bf16.msra.mxu1 %v2573_v5  ;;  %v2641_v5 = vld [vmem:[#allocation8 + $0x94] sm:$0xf0] }
  0xd8   :  { %v391_v17 = vadd.f32 %v390_v12, %v3182_v16  ;;  %v354_v26 = vadd.f32 %v353_v18, %v3182_v16 }
  0xd9   :  { %v3220_v21 = vpack.c.bf16 %v461_v19, %v459_v10  ;;  %v431_v33 = vmax.f32 %v265_v24, 0.0 }
  0xda   :  { %v462_v20 = vmax.f32 %v391_v17, 0.0  ;;  %v432_v36 = vmax.f32 %v354_v26, 0.0 }
  0xdc   :  { %v3222_v22 = vpack.c.bf16 %v462_v20, %v460_v13  ;;  %v304_v23 = vpop.f32.mrf.mxu2 }
  0xdd   :  { %v305_v35 = vadd.f32 %v304_v23, %v3180_v15 }
  0xde   :  { %v266_v27 = vpop.f32.mrf.mxu0 }
  0xdf   :  { %v393_v25 = vpop.f32.mrf.mxu3  ;;  %v267_v28 = vadd.f32 %v266_v27, %v3180_v15  ;;  %v355_v29 = vpop.f32.mrf.mxu1  ;;  %v463_v42 = vmax.f32 %v305_v35, 0.0 }
  0xe0   :  { %v356_v30 = vadd.f32 %v355_v29, %v3182_v16  ;;  %v394_v38 = vadd.f32 %v393_v25, %v3182_v16 }
  0xe1   :  { %v433_v34 = vmax.f32 %v267_v28, 0.0 }
  0xe2   :  { %v434_v37 = vmax.f32 %v356_v30, 0.0  ;;  %v464_v45 = vmax.f32 %v394_v38, 0.0 }
  0xe3   :  { %v3230_v39 = vpack.c.bf16 %v433_v34, %v431_v33 }
  0xe4   :  { %v3232_v40 = vpack.c.bf16 %v434_v37, %v432_v36  ;;  %v306_v41 = vpop.f32.mrf.mxu2 }
  0xe5   :  { %931 = vmatmul.bf16.gmra.mxu2 %v3230_v39  ;;  %1109 = vmatmul.bf16.gmra.mxu0 %v3230_v39  ;;  %v307_v43 = vadd.f32 %v306_v41, %v3180_v15 }
  0xe6   :  { %1020 = vmatmul.bf16.gmra.mxu3 %v3232_v40  ;;  %1198 = vmatmul.bf16.gmra.mxu1 %v3232_v40  ;;  %v269_v48 = vpop.f32.mrf.mxu0 }
  0xe7   :  { %v395_v44 = vpop.f32.mrf.mxu3  ;;  %v358_v52 = vpop.f32.mrf.mxu1  ;;  %v465_v53 = vmax.f32 %v307_v43, 0.0  ;;  %v270_v3 = vadd.f32 %v269_v48, %v3180_v15 }
  0xe8   :  { %v396_v49 = vadd.f32 %v395_v44, %v3182_v16  ;;  %v359_v6 = vadd.f32 %v358_v52, %v3182_v16 }
  0xe9   :  { %v3240_v56 = vpack.c.bf16 %v465_v53, %v463_v42  ;;  %v435_v13 = vmax.f32 %v270_v3, 0.0 }
  0xea   :  { %v466_v55 = vmax.f32 %v396_v49, 0.0  ;;  %v436_v18 = vmax.f32 %v359_v6, 0.0 }
  0xec   :  { %v3242_v57 = vpack.c.bf16 %v466_v55, %v464_v45  ;;  %v309_v0 = vpop.f32.mrf.mxu2 }
  0xed   :  { %v310_v17 = vadd.f32 %v309_v0, %v3180_v15 }
  0xee   :  { %v271_v9 = vpop.f32.mrf.mxu0 }
  0xef   :  { %v398_v4 = vpop.f32.mrf.mxu3  ;;  %v272_v10 = vadd.f32 %v271_v9, %v3180_v15  ;;  %v360_v11 = vpop.f32.mrf.mxu1  ;;  %v467_v26 = vmax.f32 %v310_v17, 0.0  ;;  %v2673_v17 = vld [vmem:[#allocation8 + $0x194] sm:$0xf0] }
  0xf0   :  { %v361_v12 = vadd.f32 %v360_v11, %v3182_v16  ;;  %v399_v20 = vadd.f32 %v398_v4, %v3182_v16  ;;  %v2424_v4 = vld [vmem:[#allocation8 + $0x88] sm:$0xf] }
  0xf1   :  { %v437_v14 = vmax.f32 %v272_v10, 0.0  ;;  %v2425_v10 = vor.u32 %v2641_v5, %v2424_v4 }
  0xf2   :  { %v438_v19 = vmax.f32 %v361_v12, 0.0  ;;  %v468_v29 = vmax.f32 %v399_v20, 0.0  ;;  %v2426_v20 = vld [vmem:[#allocation8 + $0x98] sm:$0xf0] }
  0xf3   :  { %v3250_v23 = vpack.c.bf16 %v437_v14, %v435_v13  ;;  %1272 = vmatpush.bf16.msra.mxu2 %v2425_v10  ;;  %v2552_v14 = vld [vmem:[#allocation8 + $0x188] sm:$0xf] }
  0xf4   :  { %v3252_v24 = vpack.c.bf16 %v438_v19, %v436_v18  ;;  %v311_v25 = vpop.f32.mrf.mxu2  ;;  %v2553_v18 = vor.u32 %v2673_v17, %v2552_v14  ;;  %v2639_v19 = vld [vmem:[#allocation8 + $0x8c] sm:$0xf] }
  0xf5   :  { %936 = vmatmul.bf16.gmra.mxu2 %v3250_v23  ;;  %1114 = vmatmul.bf16.gmra.mxu0 %v3250_v23  ;;  %v312_v27 = vadd.f32 %v311_v25, %v3180_v15  ;;  %v2671_v25 = vld [vmem:[#allocation8 + $0x18c] sm:$0xf] }
  0xf6   :  { %1025 = vmatmul.bf16.gmra.mxu3 %v3252_v24  ;;  %1203 = vmatmul.bf16.gmra.mxu1 %v3252_v24  ;;  %v274_v30 = vpop.f32.mrf.mxu0 }
  0xf7   :  { %v400_v28 = vpop.f32.mrf.mxu3  ;;  %v363_v34 = vpop.f32.mrf.mxu1  ;;  %v469_v35 = vmax.f32 %v312_v27, 0.0  ;;  %v275_v42 = vadd.f32 %v274_v30, %v3180_v15  ;;  %v2429_v27 = vor.u32 %v2639_v19, %v2426_v20  ;;  %1361 = vmatpush.bf16.msra.mxu3 %v2553_v18 }
  0xf8   :  { %v401_v33 = vadd.f32 %v400_v28, %v3182_v16  ;;  %v364_v44 = vadd.f32 %v363_v34, %v3182_v16  ;;  %v2554_v28 = vld [vmem:[#allocation8 + $0x198] sm:$0xf0] }
  0xf9   :  { %v3260_v37 = vpack.c.bf16 %v469_v35, %v467_v26  ;;  %v439_v51 = vmax.f32 %v275_v42, 0.0  ;;  %1450 = vmatpush.bf16.msra.mxu0 %v2429_v27 }
  0xfa   :  { %v470_v36 = vmax.f32 %v401_v33, 0.0  ;;  %v440_v54 = vmax.f32 %v364_v44, 0.0  ;;  %v2557_v33 = vor.u32 %v2671_v25, %v2554_v28 }
  0xfc   :  { %v3262_v38 = vpack.c.bf16 %v470_v36, %v468_v29  ;;  %v314_v41 = vpop.f32.mrf.mxu2  ;;  %1539 = vmatpush.bf16.msra.mxu1 %v2557_v33 }
  0xfd   :  { %v315_v53 = vadd.f32 %v314_v41, %v3180_v15 }
  0xfe   :  { %v276_v45 = vpop.f32.mrf.mxu0 }
  0xff   :  { %v403_v43 = vpop.f32.mrf.mxu3  ;;  %v277_v48 = vadd.f32 %v276_v45, %v3180_v15  ;;  %v365_v49 = vpop.f32.mrf.mxu1  ;;  %v471_v62 = vmax.f32 %v315_v53, 0.0 }
 0x100   :  { %v366_v50 = vadd.f32 %v365_v49, %v3182_v16  ;;  %v404_v58 = vadd.f32 %v403_v43, %v3182_v16 }
 0x101   :  { %v441_v52 = vmax.f32 %v277_v48, 0.0 }
 0x102   :  { %v442_v55 = vmax.f32 %v366_v50, 0.0  ;;  %v472_v1 = vmax.f32 %v404_v58, 0.0 }
 0x103   :  { %v3270_v59 = vpack.c.bf16 %v441_v52, %v439_v51 }
 0x104   :  { %v3272_v60 = vpack.c.bf16 %v442_v55, %v440_v54  ;;  %v316_v61 = vpop.f32.mrf.mxu2 }
 0x105   :  { %941 = vmatmul.bf16.gmra.mxu2 %v3270_v59  ;;  %1119 = vmatmul.bf16.gmra.mxu0 %v3270_v59  ;;  %v317_v63 = vadd.f32 %v316_v61, %v3180_v15 }
 0x106   :  { %1030 = vmatmul.bf16.gmra.mxu3 %v3272_v60  ;;  %1208 = vmatmul.bf16.gmra.mxu1 %v3272_v60  ;;  %v279_v2 = vpop.f32.mrf.mxu0 }
 0x107   :  { %v405_v0 = vpop.f32.mrf.mxu3  ;;  %v368_v6 = vpop.f32.mrf.mxu1  ;;  %v473_v9 = vmax.f32 %v317_v63, 0.0  ;;  %v280_v29 = vadd.f32 %v279_v2, %v3180_v15 }
 0x108   :  { %v406_v3 = vadd.f32 %v405_v0, %v3182_v16  ;;  %v369_v34 = vadd.f32 %v368_v6, %v3182_v16 }
 0x109   :  { %v3280_v12 = vpack.c.bf16 %v473_v9, %v471_v62  ;;  %v443_v43 = vmax.f32 %v280_v29, 0.0 }
 0x10a   :  { %v474_v11 = vmax.f32 %v406_v3, 0.0  ;;  %v444_v48 = vmax.f32 %v369_v34, 0.0 }
 0x10c   :  { %v3282_v13 = vpack.c.bf16 %v474_v11, %v472_v1  ;;  %v319_v26 = vpop.f32.mrf.mxu2 }
 0x10d   :  { %v320_v45 = vadd.f32 %v319_v26, %v3180_v15 }
 0x10e   :  { %v281_v35 = vpop.f32.mrf.mxu0 }
 0x10f   :  { %v408_v30 = vpop.f32.mrf.mxu3  ;;  %v282_v36 = vadd.f32 %v281_v35, %v3180_v15  ;;  %v370_v41 = vpop.f32.mrf.mxu1  ;;  %v475_v54 = vmax.f32 %v320_v45, 0.0 }
 0x110   :  { %v371_v42 = vadd.f32 %v370_v41, %v3182_v16  ;;  %v409_v50 = vadd.f32 %v408_v30, %v3182_v16 }
 0x111   :  { %v445_v44 = vmax.f32 %v282_v36, 0.0 }
 0x112   :  { %v446_v49 = vmax.f32 %v371_v42, 0.0  ;;  %v476_v61 = vmax.f32 %v409_v50, 0.0 }
 0x113   :  { %v3290_v51 = vpack.c.bf16 %v445_v44, %v443_v43 }
 0x114   :  { %v3292_v52 = vpack.c.bf16 %v446_v49, %v444_v48  ;;  %v321_v53 = vpop.f32.mrf.mxu2 }
 0x115   :  { %946 = vmatmul.bf16.gmra.mxu2 %v3290_v51  ;;  %1124 = vmatmul.bf16.gmra.mxu0 %v3290_v51  ;;  %v322_v55 = vadd.f32 %v321_v53, %v3180_v15 }
 0x116   :  { %1035 = vmatmul.bf16.gmra.mxu3 %v3292_v52  ;;  %1213 = vmatmul.bf16.gmra.mxu1 %v3292_v52  ;;  %v284_v62 = vpop.f32.mrf.mxu0 }
 0x117   :  { %v410_v58 = vpop.f32.mrf.mxu3  ;;  %v373_v0 = vpop.f32.mrf.mxu1  ;;  %v477_v1 = vmax.f32 %v322_v55, 0.0  ;;  %v285_v6 = vadd.f32 %v284_v62, %v3180_v15 }
 0x118   :  { %v411_v63 = vadd.f32 %v410_v58, %v3182_v16  ;;  %v374_v10 = vadd.f32 %v373_v0, %v3182_v16 }
 0x119   :  { %v3300_v3 = vpack.c.bf16 %v477_v1, %v475_v54  ;;  %v447_v19 = vmax.f32 %v285_v6, 0.0 }
 0x11a   :  { %v478_v2 = vmax.f32 %v411_v63, 0.0  ;;  %v448_v26 = vmax.f32 %v374_v10, 0.0 }
 0x11c   :  { %v3302_v4 = vpack.c.bf16 %v478_v2, %v476_v61  ;;  %v324_v5 = vpop.f32.mrf.mxu2 }
 0x11d   :  { %v325_v25 = vadd.f32 %v324_v5, %v3180_v15 }
 0x11e   :  { %v286_v11 = vpop.f32.mrf.mxu0 }
 0x11f   :  { %v413_v9 = vpop.f32.mrf.mxu3  ;;  %v287_v14 = vadd.f32 %v286_v11, %v3180_v15  ;;  %v375_v17 = vpop.f32.mrf.mxu1  ;;  %v479_v34 = vmax.f32 %v325_v25, 0.0 }
 0x120   :  { %v376_v18 = vadd.f32 %v375_v17, %v3182_v16  ;;  %v414_v28 = vadd.f32 %v413_v9, %v3182_v16 }
 0x121   :  { %v449_v20 = vmax.f32 %v287_v14, 0.0 }
 0x122   :  { %v450_v27 = vmax.f32 %v376_v18, 0.0  ;;  %v480_v41 = vmax.f32 %v414_v28, 0.0  ;;  %v2408_v18 = vld [vmem:[#allocation8 + $0x68] sm:$0xf] }
 0x123   :  { %v3310_v29 = vpack.c.bf16 %v449_v20, %v447_v19  ;;  %v2637_v19 = vld [vmem:[#allocation8 + $0x74] sm:$0xf0]  ;;  %v2536_v20 = vld [vmem:[#allocation8 + $0x168] sm:$0xf] }
 0x124   :  { %v3312_v30 = vpack.c.bf16 %v450_v27, %v448_v26  ;;  %v326_v33 = vpop.f32.mrf.mxu2  ;;  %v2409_v28 = vor.u32 %v2637_v19, %v2408_v18 }
 0x125   :  { %951 = vmatmul.bf16.gmra.mxu2 %v3310_v29  ;;  %1129 = vmatmul.bf16.gmra.mxu0 %v3310_v29  ;;  %v327_v35 = vadd.f32 %v326_v33, %v3180_v15  ;;  %v2669_v33 = vld [vmem:[#allocation8 + $0x174] sm:$0xf0] }
 0x126   :  { %1040 = vmatmul.bf16.gmra.mxu3 %v3312_v30  ;;  %1218 = vmatmul.bf16.gmra.mxu1 %v3312_v30  ;;  %v289_v42 = vpop.f32.mrf.mxu0 }
 0x127   :  { %v415_v36 = vpop.f32.mrf.mxu3  ;;  %v378_v44 = vpop.f32.mrf.mxu1  ;;  %v481_v45 = vmax.f32 %v327_v35, 0.0  ;;  %v290_v54 = vadd.f32 %v289_v42, %v3180_v15  ;;  %1273 = vmatpush.bf16.msra.mxu2 %v2409_v28 }
 0x128   :  { %v416_v43 = vadd.f32 %v415_v36, %v3182_v16  ;;  %v379_v58 = vadd.f32 %v378_v44, %v3182_v16  ;;  %v2537_v36 = vor.u32 %v2669_v33, %v2536_v20 }
 0x129   :  { %v3320_v49 = vpack.c.bf16 %v481_v45, %v479_v34  ;;  %v451_v1 = vmax.f32 %v290_v54, 0.0  ;;  %v2635_v45 = vld [vmem:[#allocation8 + $0x6c] sm:$0xf] }
 0x12a   :  { %v482_v48 = vmax.f32 %v416_v43, 0.0  ;;  %v452_v6 = vmax.f32 %v379_v58, 0.0  ;;  %1362 = vmatpush.bf16.msra.mxu3 %v2537_v36 }
 0x12c   :  { %v3322_v50 = vpack.c.bf16 %v482_v48, %v480_v41  ;;  %v329_v53 = vpop.f32.mrf.mxu2  ;;  %v2410_v48 = vld [vmem:[#allocation8 + $0x78] sm:$0xf0] }
 0x12d   :  { %v330_v5 = vadd.f32 %v329_v53, %v3180_v15  ;;  %v2667_v53 = vld [vmem:[#allocation8 + $0x16c] sm:$0xf]  ;;  %v2413_v54 = vor.u32 %v2635_v45, %v2410_v48  ;;  %v2392_v48 = vld [vmem:[#allocation8 + $0x48] sm:$0xf] }
 0x12e   :  { %v291_v61 = vpop.f32.mrf.mxu0 }
 0x12f   :  { %v418_v55 = vpop.f32.mrf.mxu3  ;;  %v292_v62 = vadd.f32 %v291_v61, %v3180_v15  ;;  %v380_v63 = vpop.f32.mrf.mxu1  ;;  %v483_v25 = vmax.f32 %v330_v5, 0.0  ;;  %1451 = vmatpush.bf16.msra.mxu0 %v2413_v54 }
 0x130   :  { %v381_v0 = vadd.f32 %v380_v63, %v3182_v16  ;;  %v419_v10 = vadd.f32 %v418_v55, %v3182_v16  ;;  %v2538_v55 = vld [vmem:[#allocation8 + $0x178] sm:$0xf0] }
 0x131   :  { %v453_v2 = vmax.f32 %v292_v62, 0.0  ;;  %v2541_v58 = vor.u32 %v2667_v53, %v2538_v55  ;;  %v2633_v53 = vld [vmem:[#allocation8 + $0x54] sm:$0xf0] }
 0x132   :  { %v454_v9 = vmax.f32 %v381_v0, 0.0  ;;  %v484_v34 = vmax.f32 %v419_v10, 0.0 }
 0x133   :  { %v3330_v11 = vpack.c.bf16 %v453_v2, %v451_v1  ;;  %1540 = vmatpush.bf16.msra.mxu1 %v2541_v58 }
 0x134   :  { %v3332_v14 = vpack.c.bf16 %v454_v9, %v452_v6  ;;  %v331_v17 = vpop.f32.mrf.mxu2 }
 0x135   :  { %956 = vmatmul.bf16.gmra.mxu2 %v3330_v11  ;;  %1134 = vmatmul.bf16.gmra.mxu0 %v3330_v11  ;;  %v332_v26 = vadd.f32 %v331_v17, %v3180_v15  ;;  %v583_v15 = vld [vmem:[#allocation10] sm:$0xf] }
 0x136   :  { %1045 = vmatmul.bf16.gmra.mxu3 %v3332_v14  ;;  %1223 = vmatmul.bf16.gmra.mxu1 %v3332_v14  ;;  %v3344_v61 = vperm.slane %v583_v15, 1  ;;  %v3349_v1 = vperm.slane %v583_v15, 0 }
 0x137   :  { %v420_v27 = vpop.f32.mrf.mxu3  ;;  %v485_v41 = vmax.f32 %v332_v26, 0.0 }
 0x138   :  { %v421_v35 = vadd.f32 %v420_v27, %v3182_v16 }
 0x139   :  { %v3340_v43 = vpack.c.bf16 %v485_v41, %v483_v25 }
 0x13a   :  { %v486_v42 = vmax.f32 %v421_v35, 0.0 }
 0x13c   :  { %v3342_v44 = vpack.c.bf16 %v486_v42, %v484_v34 }
 0x142   :  { %v1100_v16 = vpop.f32.mrf.mxu0 }
 0x143   :  { %v1101_v62 = vadd.f32 %v1100_v16, %v3344_v61  ;;  %v1189_v63 = vpop.f32.mrf.mxu1  ;;  %v2393_v16 = vor.u32 %v2633_v53, %v2392_v48 }
 0x145   :  { %v1190_v0 = vadd.f32 %v1189_v63, %v1101_v62  ;;  %961 = vmatmul.bf16.gmra.mxu2 %v3200_v46  ;;  %1139 = vmatmul.bf16.gmra.mxu0 %v3200_v46  ;;  %v2520_v62 = vld [vmem:[#allocation8 + $0x148] sm:$0xf]  ;;  %v2665_v63 = vld [vmem:[#allocation8 + $0x154] sm:$0xf0] }
 0x146   :  { %1050 = vmatmul.bf16.gmra.mxu3 %v3202_v47  ;;  %1228 = vmatmul.bf16.gmra.mxu1 %v3202_v47 }
 0x147   :  { %v1626_v2 = vmul.f32 0.5, %v1190_v0  ;;  %1274 = vmatpush.bf16.msra.mxu2 %v2393_v16 }
 0x148   :  { %v922_v5 = vpop.f32.mrf.mxu2 }
 0x149   :  { %2714 = vtanh.f32 %v1626_v2  ;;  %v923_v6 = vadd.f32 %v922_v5, %v3349_v1  ;;  %v1011_v9 = vpop.f32.mrf.mxu3  ;;  %v2521_v2 = vor.u32 %v2665_v63, %v2520_v62 }
 0x14a   :  { %v1102_v10 = vpop.f32.mrf.mxu0 }
 0x14b   :  { %v1012_v17 = vadd.f32 %v1011_v9, %v923_v6  ;;  %v1103_v18 = vadd.f32 %v1102_v10, %v3344_v61  ;;  %v1191_v19 = vpop.f32.mrf.mxu1  ;;  %1363 = vmatpush.bf16.msra.mxu3 %v2521_v2 }
 0x14d   :  { %v1625_v20 = vmul.f32 0.5, %v1012_v17  ;;  %v1192_v25 = vadd.f32 %v1191_v19, %v1103_v18 }
 0x14f   :  { %v2715_v26 = vpop.eup %2714  ;;  %2716 = vtanh.f32 %v1625_v20  ;;  %v1630_v27 = vmul.f32 0.5, %v1192_v25 }
 0x150   :  { %v1882_v28 = vmul.f32 0.5, %v2715_v26  ;;  %v924_v33 = vpop.f32.mrf.mxu2 }
 0x151   :  { %2718 = vtanh.f32 %v1630_v27  ;;  %v925_v34 = vadd.f32 %v924_v33, %v3349_v1  ;;  %v1013_v35 = vpop.f32.mrf.mxu3  ;;  %v2631_v33 = vld [vmem:[#allocation8 + $0x4c] sm:$0xf] }
 0x152   :  { %v2010_v36 = vadd.f32 0.5, %v1882_v28  ;;  %v1105_v41 = vpop.f32.mrf.mxu0 }
 0x153   :  { %v1014_v42 = vadd.f32 %v1013_v35, %v925_v34  ;;  %v1106_v15 = vadd.f32 %v1105_v41, %v3344_v61  ;;  %v1194_v45 = vpop.f32.mrf.mxu1  ;;  %v2394_v34 = vld [vmem:[#allocation8 + $0x58] sm:$0xf0] }
 0x154   :  { %2138 = vst [vmem:[#allocation11 + $0x8] sm:$0xff] %v2010_v36 }
 0x155   :  { %v2717_v54 = vpop.eup %2716  ;;  %v1629_v55 = vmul.f32 0.5, %v1014_v42  ;;  %v1195_v58 = vadd.f32 %v1194_v45, %v1106_v15  ;;  %966 = vmatmul.bf16.gmra.mxu2 %v3220_v21  ;;  %1144 = vmatmul.bf16.gmra.mxu0 %v3220_v21  ;;  %v2397_v42 = vor.u32 %v2631_v33, %v2394_v34  ;;  %v2663_v15 = vld [vmem:[#allocation8 + $0x14c] sm:$0xf]  ;;  %v2522_v45 = vld [vmem:[#allocation8 + $0x158] sm:$0xf0] }
 0x156   :  { %v1881_v0 = vmul.f32 0.5, %v2717_v54  ;;  %1055 = vmatmul.bf16.gmra.mxu3 %v3222_v22  ;;  %1233 = vmatmul.bf16.gmra.mxu1 %v3222_v22  ;;  %v2525_v53 = vor.u32 %v2663_v15, %v2522_v45 }
 0x157   :  { %v2719_v5 = vpop.eup %2718  ;;  %2720 = vtanh.f32 %v1629_v55  ;;  %v1634_v6 = vmul.f32 0.5, %v1195_v58  ;;  %1452 = vmatpush.bf16.msra.mxu0 %v2397_v42 }
 0x158   :  { %v2009_v9 = vadd.f32 0.5, %v1881_v0  ;;  %v1886_v10 = vmul.f32 0.5, %v2719_v5  ;;  %v927_v17 = vpop.f32.mrf.mxu2  ;;  %1541 = vmatpush.bf16.msra.mxu1 %v2525_v53 }
 0x159   :  { %2722 = vtanh.f32 %v1634_v6  ;;  %v928_v18 = vadd.f32 %v927_v17, %v3349_v1  ;;  %v1016_v19 = vpop.f32.mrf.mxu3 }
 0x15a   :  { %2137 = vst [vmem:[#allocation11] sm:$0xff] %v2009_v9  ;;  %v2014_v20 = vadd.f32 0.5, %v1886_v10  ;;  %v1107_v25 = vpop.f32.mrf.mxu0 }
 0x15b   :  { %v1017_v26 = vadd.f32 %v1016_v19, %v928_v18  ;;  %v1108_v27 = vadd.f32 %v1107_v25, %v3344_v61  ;;  %v1196_v28 = vpop.f32.mrf.mxu1 }
 0x15c   :  { %2142 = vst [vmem:[#allocation11 + $0x28] sm:$0xff] %v2014_v20 }
 0x15d   :  { %v2721_v35 = vpop.eup %2720  ;;  %v1633_v36 = vmul.f32 0.5, %v1017_v26  ;;  %v1197_v41 = vadd.f32 %v1196_v28, %v1108_v27 }
 0x15e   :  { %v1885_v48 = vmul.f32 0.5, %v2721_v35 }
 0x15f   :  { %v2723_v54 = vpop.eup %2722  ;;  %2724 = vtanh.f32 %v1633_v36  ;;  %v1638_v55 = vmul.f32 0.5, %v1197_v41 }
 0x160   :  { %v2013_v58 = vadd.f32 0.5, %v1885_v48  ;;  %v1890_v16 = vmul.f32 0.5, %v2723_v54  ;;  %v929_v62 = vpop.f32.mrf.mxu2 }
 0x161   :  { %2726 = vtanh.f32 %v1638_v55  ;;  %v930_v63 = vadd.f32 %v929_v62, %v3349_v1  ;;  %v1018_v0 = vpop.f32.mrf.mxu3 }
 0x162   :  { %2141 = vst [vmem:[#allocation11 + $0x20] sm:$0xff] %v2013_v58  ;;  %v2018_v2 = vadd.f32 0.5, %v1890_v16  ;;  %v1110_v5 = vpop.f32.mrf.mxu0 }
 0x163   :  { %v1019_v6 = vadd.f32 %v1018_v0, %v930_v63  ;;  %v1111_v9 = vadd.f32 %v1110_v5, %v3344_v61  ;;  %v1199_v10 = vpop.f32.mrf.mxu1 }
 0x164   :  { %2146 = vst [vmem:[#allocation11 + $0x48] sm:$0xff] %v2018_v2 }
 0x165   :  { %v2725_v17 = vpop.eup %2724  ;;  %v1637_v18 = vmul.f32 0.5, %v1019_v6  ;;  %v1200_v19 = vadd.f32 %v1199_v10, %v1111_v9  ;;  %971 = vmatmul.bf16.gmra.mxu2 %v3240_v56  ;;  %1149 = vmatmul.bf16.gmra.mxu0 %v3240_v56 }
 0x166   :  { %v1889_v20 = vmul.f32 0.5, %v2725_v17  ;;  %1060 = vmatmul.bf16.gmra.mxu3 %v3242_v57  ;;  %1238 = vmatmul.bf16.gmra.mxu1 %v3242_v57 }
 0x167   :  { %v2727_v25 = vpop.eup %2726  ;;  %2728 = vtanh.f32 %v1637_v18  ;;  %v1642_v26 = vmul.f32 0.5, %v1200_v19  ;;  %v2376_v19 = vld [vmem:[#allocation8 + $0x28] sm:$0xf] }
 0x168   :  { %v2017_v27 = vadd.f32 0.5, %v1889_v20  ;;  %v1894_v28 = vmul.f32 0.5, %v2727_v25  ;;  %v932_v33 = vpop.f32.mrf.mxu2  ;;  %v2629_v20 = vld [vmem:[#allocation8 + $0x34] sm:$0xf0] }
 0x169   :  { %2730 = vtanh.f32 %v1642_v26  ;;  %v933_v34 = vadd.f32 %v932_v33, %v3349_v1  ;;  %v1021_v35 = vpop.f32.mrf.mxu3  ;;  %v2504_v33 = vld [vmem:[#allocation8 + $0x128] sm:$0xf] }
 0x16a   :  { %2145 = vst [vmem:[#allocation11 + $0x40] sm:$0xff] %v2017_v27  ;;  %v2022_v36 = vadd.f32 0.5, %v1894_v28  ;;  %v1112_v41 = vpop.f32.mrf.mxu0  ;;  %v2377_v28 = vor.u32 %v2629_v20, %v2376_v19 }
 0x16b   :  { %v1022_v42 = vadd.f32 %v1021_v35, %v933_v34  ;;  %v1113_v15 = vadd.f32 %v1112_v41, %v3344_v61  ;;  %v1201_v45 = vpop.f32.mrf.mxu1  ;;  %v2661_v34 = vld [vmem:[#allocation8 + $0x134] sm:$0xf0] }
 0x16c   :  { %2150 = vst [vmem:[#allocation11 + $0x68] sm:$0xff] %v2022_v36  ;;  %v2505_v36 = vor.u32 %v2661_v34, %v2504_v33  ;;  %1275 = vmatpush.bf16.msra.mxu2 %v2377_v28 }
 0x16d   :  { %v2729_v48 = vpop.eup %2728  ;;  %v1641_v53 = vmul.f32 0.5, %v1022_v42  ;;  %v1202_v54 = vadd.f32 %v1201_v45, %v1113_v15 }
 0x16e   :  { %v1893_v55 = vmul.f32 0.5, %v2729_v48  ;;  %1364 = vmatpush.bf16.msra.mxu3 %v2505_v36 }
 0x16f   :  { %v2731_v58 = vpop.eup %2730  ;;  %2732 = vtanh.f32 %v1641_v53  ;;  %v1646_v16 = vmul.f32 0.5, %v1202_v54 }
 0x170   :  { %v2021_v62 = vadd.f32 0.5, %v1893_v55  ;;  %v1898_v63 = vmul.f32 0.5, %v2731_v58  ;;  %v934_v0 = vpop.f32.mrf.mxu2 }
 0x171   :  { %2734 = vtanh.f32 %v1646_v16  ;;  %v935_v2 = vadd.f32 %v934_v0, %v3349_v1  ;;  %v1023_v5 = vpop.f32.mrf.mxu3  ;;  %v2627_v0 = vld [vmem:[#allocation8 + $0x2c] sm:$0xf] }
 0x172   :  { %2149 = vst [vmem:[#allocation11 + $0x60] sm:$0xff] %v2021_v62  ;;  %v2026_v6 = vadd.f32 0.5, %v1898_v63  ;;  %v1115_v9 = vpop.f32.mrf.mxu0 }
 0x173   :  { %v1024_v10 = vadd.f32 %v1023_v5, %v935_v2  ;;  %v1116_v17 = vadd.f32 %v1115_v9, %v3344_v61  ;;  %v1204_v18 = vpop.f32.mrf.mxu1  ;;  %v2378_v2 = vld [vmem:[#allocation8 + $0x38] sm:$0xf0] }
 0x174   :  { %2154 = vst [vmem:[#allocation11 + $0x88] sm:$0xff] %v2026_v6 }
 0x175   :  { %v2733_v25 = vpop.eup %2732  ;;  %v1645_v26 = vmul.f32 0.5, %v1024_v10  ;;  %v1205_v27 = vadd.f32 %v1204_v18, %v1116_v17  ;;  %976 = vmatmul.bf16.gmra.mxu2 %v3260_v37  ;;  %1154 = vmatmul.bf16.gmra.mxu0 %v3260_v37  ;;  %v2381_v10 = vor.u32 %v2627_v0, %v2378_v2  ;;  %v2659_v17 = vld [vmem:[#allocation8 + $0x12c] sm:$0xf]  ;;  %v2506_v18 = vld [vmem:[#allocation8 + $0x138] sm:$0xf0] }
 0x176   :  { %v1897_v35 = vmul.f32 0.5, %v2733_v25  ;;  %1065 = vmatmul.bf16.gmra.mxu3 %v3262_v38  ;;  %1243 = vmatmul.bf16.gmra.mxu1 %v3262_v38  ;;  %v2509_v20 = vor.u32 %v2659_v17, %v2506_v18 }
 0x177   :  { %v2735_v41 = vpop.eup %2734  ;;  %2736 = vtanh.f32 %v1645_v26  ;;  %v1650_v42 = vmul.f32 0.5, %v1205_v27  ;;  %1453 = vmatpush.bf16.msra.mxu0 %v2381_v10 }
 0x178   :  { %v2025_v15 = vadd.f32 0.5, %v1897_v35  ;;  %v1902_v45 = vmul.f32 0.5, %v2735_v41  ;;  %v937_v48 = vpop.f32.mrf.mxu2  ;;  %1542 = vmatpush.bf16.msra.mxu1 %v2509_v20 }
 0x179   :  { %2738 = vtanh.f32 %v1650_v42  ;;  %v938_v53 = vadd.f32 %v937_v48, %v3349_v1  ;;  %v1026_v54 = vpop.f32.mrf.mxu3 }
 0x17a   :  { %2153 = vst [vmem:[#allocation11 + $0x80] sm:$0xff] %v2025_v15  ;;  %v2030_v55 = vadd.f32 0.5, %v1902_v45  ;;  %v1117_v58 = vpop.f32.mrf.mxu0 }
 0x17b   :  { %v1027_v16 = vadd.f32 %v1026_v54, %v938_v53  ;;  %v1118_v62 = vadd.f32 %v1117_v58, %v3344_v61  ;;  %v1206_v63 = vpop.f32.mrf.mxu1 }
 0x17c   :  { %2158 = vst [vmem:[#allocation11 + $0xa8] sm:$0xff] %v2030_v55 }
 0x17d   :  { %v2737_v5 = vpop.eup %2736  ;;  %v1649_v6 = vmul.f32 0.5, %v1027_v16  ;;  %v1207_v9 = vadd.f32 %v1206_v63, %v1118_v62 }
 0x17e   :  { %v1901_v19 = vmul.f32 0.5, %v2737_v5 }
 0x17f   :  { %v2739_v25 = vpop.eup %2738  ;;  %2740 = vtanh.f32 %v1649_v6  ;;  %v1654_v26 = vmul.f32 0.5, %v1207_v9 }
 0x180   :  { %v2029_v27 = vadd.f32 0.5, %v1901_v19  ;;  %v1906_v28 = vmul.f32 0.5, %v2739_v25  ;;  %v939_v33 = vpop.f32.mrf.mxu2 }
 0x181   :  { %2742 = vtanh.f32 %v1654_v26  ;;  %v940_v34 = vadd.f32 %v939_v33, %v3349_v1  ;;  %v1028_v35 = vpop.f32.mrf.mxu3 }
 0x182   :  { %2157 = vst [vmem:[#allocation11 + $0xa0] sm:$0xff] %v2029_v27  ;;  %v2034_v36 = vadd.f32 0.5, %v1906_v28  ;;  %v1120_v41 = vpop.f32.mrf.mxu0 }
 0x183   :  { %v1029_v42 = vadd.f32 %v1028_v35, %v940_v34  ;;  %v1121_v15 = vadd.f32 %v1120_v41, %v3344_v61  ;;  %v1209_v45 = vpop.f32.mrf.mxu1 }
 0x184   :  { %2162 = vst [vmem:[#allocation11 + $0xc8] sm:$0xff] %v2034_v36 }
 0x185   :  { %v2741_v48 = vpop.eup %2740  ;;  %v1653_v53 = vmul.f32 0.5, %v1029_v42  ;;  %v1210_v54 = vadd.f32 %v1209_v45, %v1121_v15  ;;  %981 = vmatmul.bf16.gmra.mxu2 %v3280_v12  ;;  %1159 = vmatmul.bf16.gmra.mxu0 %v3280_v12 }
 0x186   :  { %v1905_v55 = vmul.f32 0.5, %v2741_v48  ;;  %1070 = vmatmul.bf16.gmra.mxu3 %v3282_v13  ;;  %1248 = vmatmul.bf16.gmra.mxu1 %v3282_v13 }
 0x187   :  { %v2743_v58 = vpop.eup %2742  ;;  %2744 = vtanh.f32 %v1653_v53  ;;  %v1658_v16 = vmul.f32 0.5, %v1210_v54  ;;  %v2360_v54 = vld [vmem:[#allocation8 + $0x8] sm:$0xf] }
 0x188   :  { %v2033_v62 = vadd.f32 0.5, %v1905_v55  ;;  %v1910_v63 = vmul.f32 0.5, %v2743_v58  ;;  %v942_v0 = vpop.f32.mrf.mxu2  ;;  %v2625_v55 = vld [vmem:[#allocation8 + $0x14] sm:$0xf0] }
 0x189   :  { %2746 = vtanh.f32 %v1658_v16  ;;  %v943_v2 = vadd.f32 %v942_v0, %v3349_v1  ;;  %v1031_v5 = vpop.f32.mrf.mxu3  ;;  %v2488_v0 = vld [vmem:[#allocation8 + $0x108] sm:$0xf] }
 0x18a   :  { %2161 = vst [vmem:[#allocation11 + $0xc0] sm:$0xff] %v2033_v62  ;;  %v2038_v6 = vadd.f32 0.5, %v1910_v63  ;;  %v1122_v9 = vpop.f32.mrf.mxu0  ;;  %v2361_v63 = vor.u32 %v2625_v55, %v2360_v54 }
 0x18b   :  { %v1032_v10 = vadd.f32 %v1031_v5, %v943_v2  ;;  %v1123_v17 = vadd.f32 %v1122_v9, %v3344_v61  ;;  %v1211_v18 = vpop.f32.mrf.mxu1  ;;  %v2657_v2 = vld [vmem:[#allocation8 + $0x114] sm:$0xf0] }
 0x18c   :  { %2166 = vst [vmem:[#allocation11 + $0xe8] sm:$0xff] %v2038_v6  ;;  %v2489_v6 = vor.u32 %v2657_v2, %v2488_v0  ;;  %1276 = vmatpush.bf16.msra.mxu2 %v2361_v63 }
 0x18d   :  { %v2745_v19 = vpop.eup %2744  ;;  %v1657_v20 = vmul.f32 0.5, %v1032_v10  ;;  %v1212_v25 = vadd.f32 %v1211_v18, %v1123_v17 }
 0x18e   :  { %v1909_v26 = vmul.f32 0.5, %v2745_v19  ;;  %1365 = vmatpush.bf16.msra.mxu3 %v2489_v6 }
 0x18f   :  { %v2747_v27 = vpop.eup %2746  ;;  %2748 = vtanh.f32 %v1657_v20  ;;  %v1662_v28 = vmul.f32 0.5, %v1212_v25 }
 0x190   :  { %v2037_v33 = vadd.f32 0.5, %v1909_v26  ;;  %v1914_v34 = vmul.f32 0.5, %v2747_v27  ;;  %v944_v35 = vpop.f32.mrf.mxu2 }
 0x191   :  { %2750 = vtanh.f32 %v1662_v28  ;;  %v945_v36 = vadd.f32 %v944_v35, %v3349_v1  ;;  %v1033_v41 = vpop.f32.mrf.mxu3  ;;  %v2623_v35 = vld [vmem:[#allocation8 + $0xc] sm:$0xf] }
 0x192   :  { %2165 = vst [vmem:[#allocation11 + $0xe0] sm:$0xff] %v2037_v33  ;;  %v2042_v42 = vadd.f32 0.5, %v1914_v34  ;;  %v1125_v15 = vpop.f32.mrf.mxu0 }
 0x193   :  { %v1034_v45 = vadd.f32 %v1033_v41, %v945_v36  ;;  %v1126_v48 = vadd.f32 %v1125_v15, %v3344_v61  ;;  %v1214_v53 = vpop.f32.mrf.mxu1  ;;  %v2362_v36 = vld [vmem:[#allocation8 + $0x18] sm:$0xf0] }
 0x194   :  { %2170 = vst [vmem:[#allocation11 + $0x108] sm:$0xff] %v2042_v42 }
 0x195   :  { %v2749_v58 = vpop.eup %2748  ;;  %v1661_v16 = vmul.f32 0.5, %v1034_v45  ;;  %v1215_v62 = vadd.f32 %v1214_v53, %v1126_v48  ;;  %986 = vmatmul.bf16.gmra.mxu2 %v3300_v3  ;;  %1164 = vmatmul.bf16.gmra.mxu0 %v3300_v3  ;;  %v2365_v45 = vor.u32 %v2623_v35, %v2362_v36  ;;  %v2655_v48 = vld [vmem:[#allocation8 + $0x10c] sm:$0xf]  ;;  %v2490_v53 = vld [vmem:[#allocation8 + $0x118] sm:$0xf0] }
 0x196   :  { %v1913_v5 = vmul.f32 0.5, %v2749_v58  ;;  %1075 = vmatmul.bf16.gmra.mxu3 %v3302_v4  ;;  %1253 = vmatmul.bf16.gmra.mxu1 %v3302_v4  ;;  %v2493_v55 = vor.u32 %v2655_v48, %v2490_v53 }
 0x197   :  { %v2751_v9 = vpop.eup %2750  ;;  %2752 = vtanh.f32 %v1661_v16  ;;  %v1666_v10 = vmul.f32 0.5, %v1215_v62  ;;  %1454 = vmatpush.bf16.msra.mxu0 %v2365_v45 }
 0x198   :  { %v2041_v17 = vadd.f32 0.5, %v1913_v5  ;;  %v1918_v18 = vmul.f32 0.5, %v2751_v9  ;;  %v947_v19 = vpop.f32.mrf.mxu2  ;;  %1543 = vmatpush.bf16.msra.mxu1 %v2493_v55 }
 0x199   :  { %2754 = vtanh.f32 %v1666_v10  ;;  %v948_v20 = vadd.f32 %v947_v19, %v3349_v1  ;;  %v1036_v25 = vpop.f32.mrf.mxu3 }
 0x19a   :  { %2169 = vst [vmem:[#allocation11 + $0x100] sm:$0xff] %v2041_v17  ;;  %v2046_v26 = vadd.f32 0.5, %v1918_v18  ;;  %v1127_v27 = vpop.f32.mrf.mxu0 }
 0x19b   :  { %v1037_v28 = vadd.f32 %v1036_v25, %v948_v20  ;;  %v1128_v33 = vadd.f32 %v1127_v27, %v3344_v61  ;;  %v1216_v34 = vpop.f32.mrf.mxu1 }
 0x19c   :  { %2174 = vst [vmem:[#allocation11 + $0x128] sm:$0xff] %v2046_v26 }
 0x19d   :  { %v2753_v41 = vpop.eup %2752  ;;  %v1665_v42 = vmul.f32 0.5, %v1037_v28  ;;  %v1217_v15 = vadd.f32 %v1216_v34, %v1128_v33 }
 0x19e   :  { %v1917_v54 = vmul.f32 0.5, %v2753_v41 }
 0x19f   :  { %v2755_v58 = vpop.eup %2754  ;;  %2756 = vtanh.f32 %v1665_v42  ;;  %v1670_v16 = vmul.f32 0.5, %v1217_v15 }
 0x1a0   :  { %v2045_v62 = vadd.f32 0.5, %v1917_v54  ;;  %v1922_v63 = vmul.f32 0.5, %v2755_v58  ;;  %v949_v0 = vpop.f32.mrf.mxu2 }
 0x1a1   :  { %2758 = vtanh.f32 %v1670_v16  ;;  %v950_v2 = vadd.f32 %v949_v0, %v3349_v1  ;;  %v1038_v5 = vpop.f32.mrf.mxu3 }
 0x1a2   :  { %2173 = vst [vmem:[#allocation11 + $0x120] sm:$0xff] %v2045_v62  ;;  %v2050_v6 = vadd.f32 0.5, %v1922_v63  ;;  %v1130_v9 = vpop.f32.mrf.mxu0 }
 0x1a3   :  { %v1039_v10 = vadd.f32 %v1038_v5, %v950_v2  ;;  %v1131_v17 = vadd.f32 %v1130_v9, %v3344_v61  ;;  %v1219_v18 = vpop.f32.mrf.mxu1 }
 0x1a4   :  { %2178 = vst [vmem:[#allocation11 + $0x148] sm:$0xff] %v2050_v6 }
 0x1a5   :  { %v2757_v19 = vpop.eup %2756  ;;  %v1669_v20 = vmul.f32 0.5, %v1039_v10  ;;  %v1220_v25 = vadd.f32 %v1219_v18, %v1131_v17  ;;  %991 = vmatmul.bf16.gmra.mxu2 %v3320_v49  ;;  %1169 = vmatmul.bf16.gmra.mxu0 %v3320_v49 }
 0x1a6   :  { %v1921_v26 = vmul.f32 0.5, %v2757_v19  ;;  %1080 = vmatmul.bf16.gmra.mxu3 %v3322_v50  ;;  %1258 = vmatmul.bf16.gmra.mxu1 %v3322_v50 }
 0x1a7   :  { %v2759_v27 = vpop.eup %2758  ;;  %2760 = vtanh.f32 %v1669_v20  ;;  %v1674_v28 = vmul.f32 0.5, %v1220_v25 }
 0x1a8   :  { %v2049_v33 = vadd.f32 0.5, %v1921_v26  ;;  %v1926_v34 = vmul.f32 0.5, %v2759_v27  ;;  %v952_v35 = vpop.f32.mrf.mxu2 }
 0x1a9   :  { %2762 = vtanh.f32 %v1674_v28  ;;  %v953_v36 = vadd.f32 %v952_v35, %v3349_v1  ;;  %v1041_v41 = vpop.f32.mrf.mxu3 }
 0x1aa   :  { %2177 = vst [vmem:[#allocation11 + $0x140] sm:$0xff] %v2049_v33  ;;  %v2054_v42 = vadd.f32 0.5, %v1926_v34  ;;  %v1132_v15 = vpop.f32.mrf.mxu0 }
 0x1ab   :  { %v1042_v45 = vadd.f32 %v1041_v41, %v953_v36  ;;  %v1133_v48 = vadd.f32 %v1132_v15, %v3344_v61  ;;  %v1221_v53 = vpop.f32.mrf.mxu1 }
 0x1ac   :  { %2182 = vst [vmem:[#allocation11 + $0x168] sm:$0xff] %v2054_v42 }
 0x1ad   :  { %v2761_v54 = vpop.eup %2760  ;;  %v1673_v55 = vmul.f32 0.5, %v1042_v45  ;;  %v1222_v58 = vadd.f32 %v1221_v53, %v1133_v48 }
 0x1ae   :  { %v1925_v16 = vmul.f32 0.5, %v2761_v54 }
 0x1af   :  { %v2763_v62 = vpop.eup %2762  ;;  %2764 = vtanh.f32 %v1673_v55  ;;  %v1678_v63 = vmul.f32 0.5, %v1222_v58 }
 0x1b0   :  { %v2053_v0 = vadd.f32 0.5, %v1925_v16  ;;  %v1930_v2 = vmul.f32 0.5, %v2763_v62  ;;  %v954_v5 = vpop.f32.mrf.mxu2 }
 0x1b1   :  { %2766 = vtanh.f32 %v1678_v63  ;;  %v955_v6 = vadd.f32 %v954_v5, %v3349_v1  ;;  %v1043_v9 = vpop.f32.mrf.mxu3 }
 0x1b2   :  { %2181 = vst [vmem:[#allocation11 + $0x160] sm:$0xff] %v2053_v0  ;;  %v2058_v10 = vadd.f32 0.5, %v1930_v2  ;;  %v1135_v17 = vpop.f32.mrf.mxu0 }
 0x1b3   :  { %v1044_v18 = vadd.f32 %v1043_v9, %v955_v6  ;;  %v1136_v19 = vadd.f32 %v1135_v17, %v3344_v61  ;;  %v1224_v20 = vpop.f32.mrf.mxu1 }
 0x1b4   :  { %2186 = vst [vmem:[#allocation11 + $0x188] sm:$0xff] %v2058_v10 }
 0x1b5   :  { %v2765_v25 = vpop.eup %2764  ;;  %v1677_v26 = vmul.f32 0.5, %v1044_v18  ;;  %v1225_v27 = vadd.f32 %v1224_v20, %v1136_v19  ;;  %996 = vmatmul.bf16.gmra.mxu2 %v3340_v43  ;;  %1174 = vmatmul.bf16.gmra.mxu0 %v3340_v43 }
 0x1b6   :  { %v1929_v28 = vmul.f32 0.5, %v2765_v25  ;;  %1085 = vmatmul.bf16.gmra.mxu3 %v3342_v44  ;;  %1263 = vmatmul.bf16.gmra.mxu1 %v3342_v44 }
 0x1b7   :  { %v2767_v33 = vpop.eup %2766  ;;  %2768 = vtanh.f32 %v1677_v26  ;;  %v1682_v34 = vmul.f32 0.5, %v1225_v27 }
 0x1b8   :  { %v2057_v35 = vadd.f32 0.5, %v1929_v28  ;;  %v1934_v36 = vmul.f32 0.5, %v2767_v33  ;;  %v957_v41 = vpop.f32.mrf.mxu2 }
 0x1b9   :  { %2770 = vtanh.f32 %v1682_v34  ;;  %v958_v42 = vadd.f32 %v957_v41, %v3349_v1  ;;  %v1046_v15 = vpop.f32.mrf.mxu3 }
 0x1ba   :  { %2185 = vst [vmem:[#allocation11 + $0x180] sm:$0xff] %v2057_v35  ;;  %v2062_v45 = vadd.f32 0.5, %v1934_v36  ;;  %v1137_v48 = vpop.f32.mrf.mxu0 }
 0x1bb   :  { %v1047_v53 = vadd.f32 %v1046_v15, %v958_v42  ;;  %v1138_v54 = vadd.f32 %v1137_v48, %v3344_v61  ;;  %v1226_v55 = vpop.f32.mrf.mxu1 }
 0x1bc   :  { %2190 = vst [vmem:[#allocation11 + $0x1a8] sm:$0xff] %v2062_v45 }
 0x1bd   :  { %v2769_v58 = vpop.eup %2768  ;;  %v1681_v16 = vmul.f32 0.5, %v1047_v53  ;;  %v1227_v62 = vadd.f32 %v1226_v55, %v1138_v54 }
 0x1be   :  { %v1933_v63 = vmul.f32 0.5, %v2769_v58 }
 0x1bf   :  { %v2771_v0 = vpop.eup %2770  ;;  %2772 = vtanh.f32 %v1681_v16  ;;  %v1686_v2 = vmul.f32 0.5, %v1227_v62 }
 0x1c0   :  { %v2061_v5 = vadd.f32 0.5, %v1933_v63  ;;  %v1938_v6 = vmul.f32 0.5, %v2771_v0  ;;  %v959_v9 = vpop.f32.mrf.mxu2 }
 0x1c1   :  { %2774 = vtanh.f32 %v1686_v2  ;;  %v960_v10 = vadd.f32 %v959_v9, %v3349_v1  ;;  %v1048_v17 = vpop.f32.mrf.mxu3 }
 0x1c2   :  { %2189 = vst [vmem:[#allocation11 + $0x1a0] sm:$0xff] %v2061_v5  ;;  %v2066_v18 = vadd.f32 0.5, %v1938_v6  ;;  %v1140_v19 = vpop.f32.mrf.mxu0 }
 0x1c3   :  { %v1049_v20 = vadd.f32 %v1048_v17, %v960_v10  ;;  %v1141_v25 = vadd.f32 %v1140_v19, %v3344_v61  ;;  %v1229_v26 = vpop.f32.mrf.mxu1 }
 0x1c4   :  { %2194 = vst [vmem:[#allocation11 + $0x1c8] sm:$0xff] %v2066_v18 }
 0x1c5   :  { %v2773_v27 = vpop.eup %2772  ;;  %v1685_v28 = vmul.f32 0.5, %v1049_v20  ;;  %v1230_v33 = vadd.f32 %v1229_v26, %v1141_v25  ;;  %1277 = vmatmul.bf16.vlgmr.msra.gmra.mxu2 %v3190_v31  ;;  %1455 = vmatmul.bf16.vlgmr.msra.gmra.mxu0 %v3190_v31 }
 0x1c6   :  { %v1937_v34 = vmul.f32 0.5, %v2773_v27  ;;  %1366 = vmatmul.bf16.vlgmr.msra.gmra.mxu3 %v3192_v32  ;;  %1544 = vmatmul.bf16.vlgmr.msra.gmra.mxu1 %v3192_v32 }
 0x1c7   :  { %v2775_v35 = vpop.eup %2774  ;;  %2776 = vtanh.f32 %v1685_v28  ;;  %v1690_v36 = vmul.f32 0.5, %v1230_v33 }
 0x1c8   :  { %v2065_v41 = vadd.f32 0.5, %v1937_v34  ;;  %v1942_v42 = vmul.f32 0.5, %v2775_v35  ;;  %v962_v15 = vpop.f32.mrf.mxu2 }
 0x1c9   :  { %2778 = vtanh.f32 %v1690_v36  ;;  %v963_v45 = vadd.f32 %v962_v15, %v3349_v1  ;;  %v1051_v48 = vpop.f32.mrf.mxu3 }
 0x1ca   :  { %2193 = vst [vmem:[#allocation11 + $0x1c0] sm:$0xff] %v2065_v41  ;;  %v2070_v53 = vadd.f32 0.5, %v1942_v42  ;;  %v1142_v54 = vpop.f32.mrf.mxu0 }
 0x1cb   :  { %v1052_v55 = vadd.f32 %v1051_v48, %v963_v45  ;;  %v1143_v31 = vadd.f32 %v1142_v54, %v3344_v61  ;;  %v1231_v58 = vpop.f32.mrf.mxu1 }
 0x1cc   :  { %2198 = vst [vmem:[#allocation11 + $0x1e8] sm:$0xff] %v2070_v53 }
 0x1cd   :  { %v2777_v16 = vpop.eup %2776  ;;  %v1689_v32 = vmul.f32 0.5, %v1052_v55  ;;  %v1232_v62 = vadd.f32 %v1231_v58, %v1143_v31 }
 0x1ce   :  { %v1941_v63 = vmul.f32 0.5, %v2777_v16 }
 0x1cf   :  { %v2779_v0 = vpop.eup %2778  ;;  %2780 = vtanh.f32 %v1689_v32  ;;  %v1694_v2 = vmul.f32 0.5, %v1232_v62 }
 0x1d0   :  { %v2069_v5 = vadd.f32 0.5, %v1941_v63  ;;  %v1946_v6 = vmul.f32 0.5, %v2779_v0  ;;  %v964_v9 = vpop.f32.mrf.mxu2 }
 0x1d1   :  { %2782 = vtanh.f32 %v1694_v2  ;;  %v965_v10 = vadd.f32 %v964_v9, %v3349_v1  ;;  %v1053_v17 = vpop.f32.mrf.mxu3 }
 0x1d2   :  { %2197 = vst [vmem:[#allocation11 + $0x1e0] sm:$0xff] %v2069_v5  ;;  %v2074_v18 = vadd.f32 0.5, %v1946_v6  ;;  %v1145_v19 = vpop.f32.mrf.mxu0 }
 0x1d3   :  { %v1054_v20 = vadd.f32 %v1053_v17, %v965_v10  ;;  %v1146_v25 = vadd.f32 %v1145_v19, %v3344_v61  ;;  %v1234_v26 = vpop.f32.mrf.mxu1 }
 0x1d4   :  { %2202 = vst [vmem:[#allocation11 + $0x208] sm:$0xff] %v2074_v18 }
 0x1d5   :  { %v2781_v27 = vpop.eup %2780  ;;  %v1693_v28 = vmul.f32 0.5, %v1054_v20  ;;  %v1235_v33 = vadd.f32 %v1234_v26, %v1146_v25  ;;  %1282 = vmatmul.bf16.gmra.mxu2 %v3210_v7  ;;  %1460 = vmatmul.bf16.gmra.mxu0 %v3210_v7 }
 0x1d6   :  { %v1945_v34 = vmul.f32 0.5, %v2781_v27  ;;  %1371 = vmatmul.bf16.gmra.mxu3 %v3212_v8  ;;  %1549 = vmatmul.bf16.gmra.mxu1 %v3212_v8 }
 0x1d7   :  { %v2783_v35 = vpop.eup %2782  ;;  %2784 = vtanh.f32 %v1693_v28  ;;  %v1698_v36 = vmul.f32 0.5, %v1235_v33 }
 0x1d8   :  { %v2073_v41 = vadd.f32 0.5, %v1945_v34  ;;  %v1950_v42 = vmul.f32 0.5, %v2783_v35  ;;  %v967_v15 = vpop.f32.mrf.mxu2 }
 0x1d9   :  { %2786 = vtanh.f32 %v1698_v36  ;;  %v968_v45 = vadd.f32 %v967_v15, %v3349_v1  ;;  %v1056_v48 = vpop.f32.mrf.mxu3 }
 0x1da   :  { %2201 = vst [vmem:[#allocation11 + $0x200] sm:$0xff] %v2073_v41  ;;  %v2078_v53 = vadd.f32 0.5, %v1950_v42  ;;  %v1147_v54 = vpop.f32.mrf.mxu0 }
 0x1db   :  { %v1057_v55 = vadd.f32 %v1056_v48, %v968_v45  ;;  %v1148_v7 = vadd.f32 %v1147_v54, %v3344_v61  ;;  %v1236_v31 = vpop.f32.mrf.mxu1 }
 0x1dc   :  { %2206 = vst [vmem:[#allocation11 + $0x228] sm:$0xff] %v2078_v53 }
 0x1dd   :  { %v2785_v58 = vpop.eup %2784  ;;  %v1697_v8 = vmul.f32 0.5, %v1057_v55  ;;  %v1237_v16 = vadd.f32 %v1236_v31, %v1148_v7 }
 0x1de   :  { %v1949_v32 = vmul.f32 0.5, %v2785_v58 }
 0x1df   :  { %v2787_v62 = vpop.eup %2786  ;;  %2788 = vtanh.f32 %v1697_v8  ;;  %v1702_v63 = vmul.f32 0.5, %v1237_v16 }
 0x1e0   :  { %v2077_v0 = vadd.f32 0.5, %v1949_v32  ;;  %v1954_v2 = vmul.f32 0.5, %v2787_v62  ;;  %v969_v5 = vpop.f32.mrf.mxu2 }
 0x1e1   :  { %2790 = vtanh.f32 %v1702_v63  ;;  %v970_v6 = vadd.f32 %v969_v5, %v3349_v1  ;;  %v1058_v9 = vpop.f32.mrf.mxu3 }
 0x1e2   :  { %2205 = vst [vmem:[#allocation11 + $0x220] sm:$0xff] %v2077_v0  ;;  %v2082_v10 = vadd.f32 0.5, %v1954_v2  ;;  %v1150_v17 = vpop.f32.mrf.mxu0 }
 0x1e3   :  { %v1059_v18 = vadd.f32 %v1058_v9, %v970_v6  ;;  %v1151_v19 = vadd.f32 %v1150_v17, %v3344_v61  ;;  %v1239_v20 = vpop.f32.mrf.mxu1 }
 0x1e4   :  { %2210 = vst [vmem:[#allocation11 + $0x248] sm:$0xff] %v2082_v10 }
 0x1e5   :  { %v2789_v25 = vpop.eup %2788  ;;  %v1701_v26 = vmul.f32 0.5, %v1059_v18  ;;  %v1240_v27 = vadd.f32 %v1239_v20, %v1151_v19  ;;  %1287 = vmatmul.bf16.gmra.mxu2 %v3230_v39  ;;  %1465 = vmatmul.bf16.gmra.mxu0 %v3230_v39 }
 0x1e6   :  { %v1953_v28 = vmul.f32 0.5, %v2789_v25  ;;  %1376 = vmatmul.bf16.gmra.mxu3 %v3232_v40  ;;  %1554 = vmatmul.bf16.gmra.mxu1 %v3232_v40 }
 0x1e7   :  { %v2791_v33 = vpop.eup %2790  ;;  %2792 = vtanh.f32 %v1701_v26  ;;  %v1706_v34 = vmul.f32 0.5, %v1240_v27 }
 0x1e8   :  { %v2081_v35 = vadd.f32 0.5, %v1953_v28  ;;  %v1958_v36 = vmul.f32 0.5, %v2791_v33  ;;  %v972_v41 = vpop.f32.mrf.mxu2 }
 0x1e9   :  { %2794 = vtanh.f32 %v1706_v34  ;;  %v973_v42 = vadd.f32 %v972_v41, %v3349_v1  ;;  %v1061_v15 = vpop.f32.mrf.mxu3 }
 0x1ea   :  { %2209 = vst [vmem:[#allocation11 + $0x240] sm:$0xff] %v2081_v35  ;;  %v2086_v45 = vadd.f32 0.5, %v1958_v36  ;;  %v1152_v48 = vpop.f32.mrf.mxu0 }
 0x1eb   :  { %v1062_v53 = vadd.f32 %v1061_v15, %v973_v42  ;;  %v1153_v39 = vadd.f32 %v1152_v48, %v3344_v61  ;;  %v1241_v54 = vpop.f32.mrf.mxu1 }
 0x1ec   :  { %2214 = vst [vmem:[#allocation11 + $0x268] sm:$0xff] %v2086_v45 }
 0x1ed   :  { %v2793_v55 = vpop.eup %2792  ;;  %v1705_v40 = vmul.f32 0.5, %v1062_v53  ;;  %v1242_v7 = vadd.f32 %v1241_v54, %v1153_v39 }
 0x1ee   :  { %v1957_v31 = vmul.f32 0.5, %v2793_v55 }
 0x1ef   :  { %v2795_v58 = vpop.eup %2794  ;;  %2796 = vtanh.f32 %v1705_v40  ;;  %v1710_v8 = vmul.f32 0.5, %v1242_v7 }
 0x1f0   :  { %v2085_v16 = vadd.f32 0.5, %v1957_v31  ;;  %v1962_v32 = vmul.f32 0.5, %v2795_v58  ;;  %v974_v62 = vpop.f32.mrf.mxu2 }
 0x1f1   :  { %2798 = vtanh.f32 %v1710_v8  ;;  %v975_v63 = vadd.f32 %v974_v62, %v3349_v1  ;;  %v1063_v0 = vpop.f32.mrf.mxu3 }
 0x1f2   :  { %2213 = vst [vmem:[#allocation11 + $0x260] sm:$0xff] %v2085_v16  ;;  %v2090_v2 = vadd.f32 0.5, %v1962_v32  ;;  %v1155_v5 = vpop.f32.mrf.mxu0 }
 0x1f3   :  { %v1064_v6 = vadd.f32 %v1063_v0, %v975_v63  ;;  %v1156_v9 = vadd.f32 %v1155_v5, %v3344_v61  ;;  %v1244_v10 = vpop.f32.mrf.mxu1 }
 0x1f4   :  { %2218 = vst [vmem:[#allocation11 + $0x288] sm:$0xff] %v2090_v2 }
 0x1f5   :  { %v2797_v17 = vpop.eup %2796  ;;  %v1709_v18 = vmul.f32 0.5, %v1064_v6  ;;  %v1245_v19 = vadd.f32 %v1244_v10, %v1156_v9  ;;  %1292 = vmatmul.bf16.gmra.mxu2 %v3250_v23  ;;  %1470 = vmatmul.bf16.gmra.mxu0 %v3250_v23 }
 0x1f6   :  { %v1961_v20 = vmul.f32 0.5, %v2797_v17  ;;  %1381 = vmatmul.bf16.gmra.mxu3 %v3252_v24  ;;  %1559 = vmatmul.bf16.gmra.mxu1 %v3252_v24 }
 0x1f7   :  { %v2799_v25 = vpop.eup %2798  ;;  %2800 = vtanh.f32 %v1709_v18  ;;  %v1714_v26 = vmul.f32 0.5, %v1245_v19 }
 0x1f8   :  { %v2089_v27 = vadd.f32 0.5, %v1961_v20  ;;  %v1966_v28 = vmul.f32 0.5, %v2799_v25  ;;  %v977_v33 = vpop.f32.mrf.mxu2 }
 0x1f9   :  { %2802 = vtanh.f32 %v1714_v26  ;;  %v978_v34 = vadd.f32 %v977_v33, %v3349_v1  ;;  %v1066_v35 = vpop.f32.mrf.mxu3 }
 0x1fa   :  { %2217 = vst [vmem:[#allocation11 + $0x280] sm:$0xff] %v2089_v27  ;;  %v2094_v36 = vadd.f32 0.5, %v1966_v28  ;;  %v1157_v41 = vpop.f32.mrf.mxu0 }
 0x1fb   :  { %v1067_v42 = vadd.f32 %v1066_v35, %v978_v34  ;;  %v1158_v23 = vadd.f32 %v1157_v41, %v3344_v61  ;;  %v1246_v15 = vpop.f32.mrf.mxu1 }
 0x1fc   :  { %2222 = vst [vmem:[#allocation11 + $0x2a8] sm:$0xff] %v2094_v36 }
 0x1fd   :  { %v2801_v45 = vpop.eup %2800  ;;  %v1713_v24 = vmul.f32 0.5, %v1067_v42  ;;  %v1247_v48 = vadd.f32 %v1246_v15, %v1158_v23 }
 0x1fe   :  { %v1965_v53 = vmul.f32 0.5, %v2801_v45 }
 0x1ff   :  { %v2803_v39 = vpop.eup %2802  ;;  %2804 = vtanh.f32 %v1713_v24  ;;  %v1718_v54 = vmul.f32 0.5, %v1247_v48 }
 0x200   :  { %v2093_v55 = vadd.f32 0.5, %v1965_v53  ;;  %v1970_v40 = vmul.f32 0.5, %v2803_v39  ;;  %v979_v7 = vpop.f32.mrf.mxu2 }
 0x201   :  { %2806 = vtanh.f32 %v1718_v54  ;;  %v980_v31 = vadd.f32 %v979_v7, %v3349_v1  ;;  %v1068_v58 = vpop.f32.mrf.mxu3 }
 0x202   :  { %2221 = vst [vmem:[#allocation11 + $0x2a0] sm:$0xff] %v2093_v55  ;;  %v2098_v8 = vadd.f32 0.5, %v1970_v40  ;;  %v1160_v16 = vpop.f32.mrf.mxu0 }
 0x203   :  { %v1069_v32 = vadd.f32 %v1068_v58, %v980_v31  ;;  %v1161_v62 = vadd.f32 %v1160_v16, %v3344_v61  ;;  %v1249_v63 = vpop.f32.mrf.mxu1 }
 0x204   :  { %2226 = vst [vmem:[#allocation11 + $0x2c8] sm:$0xff] %v2098_v8 }
 0x205   :  { %v2805_v0 = vpop.eup %2804  ;;  %v1717_v2 = vmul.f32 0.5, %v1069_v32  ;;  %v1250_v5 = vadd.f32 %v1249_v63, %v1161_v62  ;;  %1297 = vmatmul.bf16.gmra.mxu2 %v3270_v59  ;;  %1475 = vmatmul.bf16.gmra.mxu0 %v3270_v59 }
 0x206   :  { %v1969_v6 = vmul.f32 0.5, %v2805_v0  ;;  %1386 = vmatmul.bf16.gmra.mxu3 %v3272_v60  ;;  %1564 = vmatmul.bf16.gmra.mxu1 %v3272_v60 }
 0x207   :  { %v2807_v9 = vpop.eup %2806  ;;  %2808 = vtanh.f32 %v1717_v2  ;;  %v1722_v10 = vmul.f32 0.5, %v1250_v5 }
 0x208   :  { %v2097_v17 = vadd.f32 0.5, %v1969_v6  ;;  %v1974_v18 = vmul.f32 0.5, %v2807_v9  ;;  %v982_v19 = vpop.f32.mrf.mxu2 }
 0x209   :  { %2810 = vtanh.f32 %v1722_v10  ;;  %v983_v20 = vadd.f32 %v982_v19, %v3349_v1  ;;  %v1071_v25 = vpop.f32.mrf.mxu3 }
 0x20a   :  { %2225 = vst [vmem:[#allocation11 + $0x2c0] sm:$0xff] %v2097_v17  ;;  %v2102_v26 = vadd.f32 0.5, %v1974_v18  ;;  %v1162_v27 = vpop.f32.mrf.mxu0 }
 0x20b   :  { %v1072_v28 = vadd.f32 %v1071_v25, %v983_v20  ;;  %v1163_v59 = vadd.f32 %v1162_v27, %v3344_v61  ;;  %v1251_v33 = vpop.f32.mrf.mxu1 }
 0x20c   :  { %2230 = vst [vmem:[#allocation11 + $0x2e8] sm:$0xff] %v2102_v26 }
 0x20d   :  { %v2809_v34 = vpop.eup %2808  ;;  %v1721_v60 = vmul.f32 0.5, %v1072_v28  ;;  %v1252_v35 = vadd.f32 %v1251_v33, %v1163_v59 }
 0x20e   :  { %v1973_v36 = vmul.f32 0.5, %v2809_v34 }
 0x20f   :  { %v2811_v41 = vpop.eup %2810  ;;  %2812 = vtanh.f32 %v1721_v60  ;;  %v1726_v42 = vmul.f32 0.5, %v1252_v35 }
 0x210   :  { %v2101_v23 = vadd.f32 0.5, %v1973_v36  ;;  %v1978_v15 = vmul.f32 0.5, %v2811_v41  ;;  %v984_v45 = vpop.f32.mrf.mxu2 }
 0x211   :  { %2814 = vtanh.f32 %v1726_v42  ;;  %v985_v24 = vadd.f32 %v984_v45, %v3349_v1  ;;  %v1073_v48 = vpop.f32.mrf.mxu3 }
 0x212   :  { %2229 = vst [vmem:[#allocation11 + $0x2e0] sm:$0xff] %v2101_v23  ;;  %v2106_v53 = vadd.f32 0.5, %v1978_v15  ;;  %v1165_v39 = vpop.f32.mrf.mxu0 }
 0x213   :  { %v1074_v54 = vadd.f32 %v1073_v48, %v985_v24  ;;  %v1166_v55 = vadd.f32 %v1165_v39, %v3344_v61  ;;  %v1254_v40 = vpop.f32.mrf.mxu1 }
 0x214   :  { %2234 = vst [vmem:[#allocation11 + $0x308] sm:$0xff] %v2106_v53 }
 0x215   :  { %v2813_v7 = vpop.eup %2812  ;;  %v1725_v31 = vmul.f32 0.5, %v1074_v54  ;;  %v1255_v58 = vadd.f32 %v1254_v40, %v1166_v55  ;;  %1302 = vmatmul.bf16.gmra.mxu2 %v3290_v51  ;;  %1480 = vmatmul.bf16.gmra.mxu0 %v3290_v51 }
 0x216   :  { %v1977_v8 = vmul.f32 0.5, %v2813_v7  ;;  %1391 = vmatmul.bf16.gmra.mxu3 %v3292_v52  ;;  %1569 = vmatmul.bf16.gmra.mxu1 %v3292_v52 }
 0x217   :  { %v2815_v16 = vpop.eup %2814  ;;  %2816 = vtanh.f32 %v1725_v31  ;;  %v1730_v32 = vmul.f32 0.5, %v1255_v58 }
 0x218   :  { %v2105_v62 = vadd.f32 0.5, %v1977_v8  ;;  %v1982_v63 = vmul.f32 0.5, %v2815_v16  ;;  %v987_v0 = vpop.f32.mrf.mxu2 }
 0x219   :  { %2818 = vtanh.f32 %v1730_v32  ;;  %v988_v2 = vadd.f32 %v987_v0, %v3349_v1  ;;  %v1076_v5 = vpop.f32.mrf.mxu3 }
 0x21a   :  { %2233 = vst [vmem:[#allocation11 + $0x300] sm:$0xff] %v2105_v62  ;;  %v2110_v6 = vadd.f32 0.5, %v1982_v63  ;;  %v1167_v9 = vpop.f32.mrf.mxu0 }
 0x21b   :  { %v1077_v10 = vadd.f32 %v1076_v5, %v988_v2  ;;  %v1168_v51 = vadd.f32 %v1167_v9, %v3344_v61  ;;  %v1256_v17 = vpop.f32.mrf.mxu1 }
 0x21c   :  { %2238 = vst [vmem:[#allocation11 + $0x328] sm:$0xff] %v2110_v6 }
 0x21d   :  { %v2817_v18 = vpop.eup %2816  ;;  %v1729_v52 = vmul.f32 0.5, %v1077_v10  ;;  %v1257_v19 = vadd.f32 %v1256_v17, %v1168_v51 }
 0x21e   :  { %v1981_v20 = vmul.f32 0.5, %v2817_v18 }
 0x21f   :  { %v2819_v25 = vpop.eup %2818  ;;  %2820 = vtanh.f32 %v1729_v52  ;;  %v1734_v26 = vmul.f32 0.5, %v1257_v19 }
 0x220   :  { %v2109_v27 = vadd.f32 0.5, %v1981_v20  ;;  %v1986_v28 = vmul.f32 0.5, %v2819_v25  ;;  %v989_v59 = vpop.f32.mrf.mxu2 }
 0x221   :  { %2822 = vtanh.f32 %v1734_v26  ;;  %v990_v33 = vadd.f32 %v989_v59, %v3349_v1  ;;  %v1078_v34 = vpop.f32.mrf.mxu3 }
 0x222   :  { %2237 = vst [vmem:[#allocation11 + $0x320] sm:$0xff] %v2109_v27  ;;  %v2114_v60 = vadd.f32 0.5, %v1986_v28  ;;  %v1170_v35 = vpop.f32.mrf.mxu0 }
 0x223   :  { %v1079_v36 = vadd.f32 %v1078_v34, %v990_v33  ;;  %v1171_v41 = vadd.f32 %v1170_v35, %v3344_v61  ;;  %v1259_v42 = vpop.f32.mrf.mxu1 }
 0x224   :  { %2242 = vst [vmem:[#allocation11 + $0x348] sm:$0xff] %v2114_v60 }
 0x225   :  { %v2821_v23 = vpop.eup %2820  ;;  %v1733_v15 = vmul.f32 0.5, %v1079_v36  ;;  %v1260_v45 = vadd.f32 %v1259_v42, %v1171_v41  ;;  %1307 = vmatmul.bf16.gmra.mxu2 %v3310_v29  ;;  %1485 = vmatmul.bf16.gmra.mxu0 %v3310_v29 }
 0x226   :  { %v1985_v24 = vmul.f32 0.5, %v2821_v23  ;;  %1396 = vmatmul.bf16.gmra.mxu3 %v3312_v30  ;;  %1574 = vmatmul.bf16.gmra.mxu1 %v3312_v30 }
 0x227   :  { %v2823_v48 = vpop.eup %2822  ;;  %2824 = vtanh.f32 %v1733_v15  ;;  %v1738_v53 = vmul.f32 0.5, %v1260_v45 }
 0x228   :  { %v2113_v39 = vadd.f32 0.5, %v1985_v24  ;;  %v1990_v54 = vmul.f32 0.5, %v2823_v48  ;;  %v992_v55 = vpop.f32.mrf.mxu2 }
 0x229   :  { %2826 = vtanh.f32 %v1738_v53  ;;  %v993_v40 = vadd.f32 %v992_v55, %v3349_v1  ;;  %v1081_v7 = vpop.f32.mrf.mxu3  ;;  %v2970_v55 = vld [vmem:[#allocation10] sm:$0xf] }
 0x22a   :  { %2241 = vst [vmem:[#allocation11 + $0x340] sm:$0xff] %v2113_v39  ;;  %v2118_v31 = vadd.f32 0.5, %v1990_v54  ;;  %v1172_v58 = vpop.f32.mrf.mxu0 }
 0x22b   :  { %v1082_v8 = vadd.f32 %v1081_v7, %v993_v40  ;;  %v1173_v29 = vadd.f32 %v1172_v58, %v3344_v61  ;;  %v1261_v16 = vpop.f32.mrf.mxu1  ;;  %v3475_v40 = vperm.slane %v2970_v55, 3 }
 0x22c   :  { %2246 = vst [vmem:[#allocation11 + $0x368] sm:$0xff] %v2118_v31 }
 0x22d   :  { %v2825_v32 = vpop.eup %2824  ;;  %v1737_v30 = vmul.f32 0.5, %v1082_v8  ;;  %v1262_v62 = vadd.f32 %v1261_v16, %v1173_v29 }
 0x22e   :  { %v1989_v63 = vmul.f32 0.5, %v2825_v32 }
 0x22f   :  { %v2827_v0 = vpop.eup %2826  ;;  %2828 = vtanh.f32 %v1737_v30  ;;  %v1742_v2 = vmul.f32 0.5, %v1262_v62 }
 0x230   :  { %v2117_v5 = vadd.f32 0.5, %v1989_v63  ;;  %v1994_v6 = vmul.f32 0.5, %v2827_v0  ;;  %v994_v9 = vpop.f32.mrf.mxu2 }
 0x231   :  { %2830 = vtanh.f32 %v1742_v2  ;;  %v995_v10 = vadd.f32 %v994_v9, %v3349_v1  ;;  %v1083_v51 = vpop.f32.mrf.mxu3 }
 0x232   :  { %2245 = vst [vmem:[#allocation11 + $0x360] sm:$0xff] %v2117_v5  ;;  %v2122_v17 = vadd.f32 0.5, %v1994_v6  ;;  %v1175_v18 = vpop.f32.mrf.mxu0  ;;  %v3481_v5 = vperm.slane %v2970_v55, 2 }
 0x233   :  { %v1084_v52 = vadd.f32 %v1083_v51, %v995_v10  ;;  %v1176_v19 = vadd.f32 %v1175_v18, %v3344_v61  ;;  %v1264_v20 = vpop.f32.mrf.mxu1 }
 0x234   :  { %2250 = vst [vmem:[#allocation11 + $0x388] sm:$0xff] %v2122_v17 }
 0x235   :  { %v2829_v25 = vpop.eup %2828  ;;  %v1741_v26 = vmul.f32 0.5, %v1084_v52  ;;  %v1265_v27 = vadd.f32 %v1264_v20, %v1176_v19  ;;  %1312 = vmatmul.bf16.gmra.mxu2 %v3330_v11  ;;  %1490 = vmatmul.bf16.gmra.mxu0 %v3330_v11 }
 0x236   :  { %v1993_v28 = vmul.f32 0.5, %v2829_v25  ;;  %1401 = vmatmul.bf16.gmra.mxu3 %v3332_v14  ;;  %1579 = vmatmul.bf16.gmra.mxu1 %v3332_v14 }
 0x237   :  { %v2831_v59 = vpop.eup %2830  ;;  %2832 = vtanh.f32 %v1741_v26  ;;  %v1746_v33 = vmul.f32 0.5, %v1265_v27 }
 0x238   :  { %v2121_v34 = vadd.f32 0.5, %v1993_v28  ;;  %v1998_v60 = vmul.f32 0.5, %v2831_v59  ;;  %v997_v35 = vpop.f32.mrf.mxu2 }
 0x239   :  { %2834 = vtanh.f32 %v1746_v33  ;;  %v998_v36 = vadd.f32 %v997_v35, %v3349_v1  ;;  %v1086_v41 = vpop.f32.mrf.mxu3 }
 0x23a   :  { %2249 = vst [vmem:[#allocation11 + $0x380] sm:$0xff] %v2121_v34  ;;  %v2126_v42 = vadd.f32 0.5, %v1998_v60  ;;  %v1177_v23 = vpop.f32.mrf.mxu0 }
 0x23b   :  { %v1087_v15 = vadd.f32 %v1086_v41, %v998_v36  ;;  %v1178_v11 = vadd.f32 %v1177_v23, %v3344_v61  ;;  %v1266_v45 = vpop.f32.mrf.mxu1 }
 0x23c   :  { %2254 = vst [vmem:[#allocation11 + $0x3a8] sm:$0xff] %v2126_v42 }
 0x23d   :  { %v2833_v24 = vpop.eup %2832  ;;  %v1745_v14 = vmul.f32 0.5, %v1087_v15  ;;  %v1267_v48 = vadd.f32 %v1266_v45, %v1178_v11 }
 0x23e   :  { %v1997_v53 = vmul.f32 0.5, %v2833_v24 }
 0x23f   :  { %v2835_v39 = vpop.eup %2834  ;;  %2836 = vtanh.f32 %v1745_v14  ;;  %v1750_v54 = vmul.f32 0.5, %v1267_v48 }
 0x240   :  { %v2125_v7 = vadd.f32 0.5, %v1997_v53  ;;  %v2002_v31 = vmul.f32 0.5, %v2835_v39  ;;  %v999_v58 = vpop.f32.mrf.mxu2 }
 0x241   :  { %2838 = vtanh.f32 %v1750_v54  ;;  %v1000_v8 = vadd.f32 %v999_v58, %v3349_v1  ;;  %v1088_v29 = vpop.f32.mrf.mxu3 }
 0x242   :  { %2253 = vst [vmem:[#allocation11 + $0x3a0] sm:$0xff] %v2125_v7  ;;  %v2130_v61 = vadd.f32 0.5, %v2002_v31  ;;  %v1456_v16 = vpop.f32.mrf.mxu0 }
 0x243   :  { %v1089_v32 = vadd.f32 %v1088_v29, %v1000_v8  ;;  %v1457_v30 = vadd.f32 %v1456_v16, %v3475_v40  ;;  %v1545_v62 = vpop.f32.mrf.mxu1 }
 0x244   :  { %2258 = vst [vmem:[#allocation11 + $0x3c8] sm:$0xff] %v2130_v61 }
 0x245   :  { %v2837_v63 = vpop.eup %2836  ;;  %v1749_v0 = vmul.f32 0.5, %v1089_v32  ;;  %v1546_v2 = vadd.f32 %v1545_v62, %v1457_v30  ;;  %1317 = vmatmul.bf16.gmra.mxu2 %v3200_v46  ;;  %1495 = vmatmul.bf16.gmra.mxu0 %v3200_v46 }
 0x246   :  { %v2001_v6 = vmul.f32 0.5, %v2837_v63  ;;  %1406 = vmatmul.bf16.gmra.mxu3 %v3202_v47  ;;  %1584 = vmatmul.bf16.gmra.mxu1 %v3202_v47 }
 0x247   :  { %v2839_v1 = vpop.eup %2838  ;;  %2840 = vtanh.f32 %v1749_v0  ;;  %v1628_v9 = vmul.f32 0.5, %v1546_v2 }
 0x248   :  { %v2129_v10 = vadd.f32 0.5, %v2001_v6  ;;  %v2006_v51 = vmul.f32 0.5, %v2839_v1  ;;  %v1278_v17 = vpop.f32.mrf.mxu2 }
 0x249   :  { %2842 = vtanh.f32 %v1628_v9  ;;  %v1279_v18 = vadd.f32 %v1278_v17, %v3481_v5  ;;  %v1367_v52 = vpop.f32.mrf.mxu3 }
 0x24a   :  { %2257 = vst [vmem:[#allocation11 + $0x3c0] sm:$0xff] %v2129_v10  ;;  %v2134_v19 = vadd.f32 0.5, %v2006_v51  ;;  %v1458_v46 = vpop.f32.mrf.mxu0 }
 0x24b   :  { %v1368_v20 = vadd.f32 %v1367_v52, %v1279_v18  ;;  %v1459_v25 = vadd.f32 %v1458_v46, %v3475_v40  ;;  %v1547_v26 = vpop.f32.mrf.mxu1 }
 0x24c   :  { %2262 = vst [vmem:[#allocation11 + $0x3e8] sm:$0xff] %v2134_v19 }
 0x24d   :  { %v2841_v27 = vpop.eup %2840  ;;  %v1627_v47 = vmul.f32 0.5, %v1368_v20  ;;  %v1548_v28 = vadd.f32 %v1547_v26, %v1459_v25 }
 0x24e   :  { %v2005_v59 = vmul.f32 0.5, %v2841_v27 }
 0x24f   :  { %v2843_v33 = vpop.eup %2842  ;;  %2844 = vtanh.f32 %v1627_v47  ;;  %v1632_v34 = vmul.f32 0.5, %v1548_v28 }
 0x250   :  { %v2133_v60 = vadd.f32 0.5, %v2005_v59  ;;  %v1884_v35 = vmul.f32 0.5, %v2843_v33  ;;  %v1280_v36 = vpop.f32.mrf.mxu2 }
 0x251   :  { %2846 = vtanh.f32 %v1632_v34  ;;  %v1281_v41 = vadd.f32 %v1280_v36, %v3481_v5  ;;  %v1369_v42 = vpop.f32.mrf.mxu3 }
 0x252   :  { %2261 = vst [vmem:[#allocation11 + $0x3e0] sm:$0xff] %v2133_v60  ;;  %v2012_v23 = vadd.f32 0.5, %v1884_v35  ;;  %v1461_v15 = vpop.f32.mrf.mxu0 }
 0x253   :  { %v1370_v11 = vadd.f32 %v1369_v42, %v1281_v41  ;;  %v1462_v45 = vadd.f32 %v1461_v15, %v3475_v40  ;;  %v1550_v24 = vpop.f32.mrf.mxu1 }
 0x254   :  { %2140 = vst [vmem:[#allocation11 + $0x18] sm:$0xff] %v2012_v23 }
 0x255   :  { %v2845_v14 = vpop.eup %2844  ;;  %v1631_v48 = vmul.f32 0.5, %v1370_v11  ;;  %v1551_v53 = vadd.f32 %v1550_v24, %v1462_v45  ;;  %1322 = vmatmul.bf16.gmra.mxu2 %v3220_v21  ;;  %1500 = vmatmul.bf16.gmra.mxu0 %v3220_v21 }
 0x256   :  { %v1883_v39 = vmul.f32 0.5, %v2845_v14  ;;  %1411 = vmatmul.bf16.gmra.mxu3 %v3222_v22  ;;  %1589 = vmatmul.bf16.gmra.mxu1 %v3222_v22 }
 0x257   :  { %v2847_v54 = vpop.eup %2846  ;;  %2848 = vtanh.f32 %v1631_v48  ;;  %v1636_v55 = vmul.f32 0.5, %v1551_v53 }
 0x258   :  { %v2011_v7 = vadd.f32 0.5, %v1883_v39  ;;  %v1888_v31 = vmul.f32 0.5, %v2847_v54  ;;  %v1283_v58 = vpop.f32.mrf.mxu2 }
 0x259   :  { %2850 = vtanh.f32 %v1636_v55  ;;  %v1284_v8 = vadd.f32 %v1283_v58, %v3481_v5  ;;  %v1372_v29 = vpop.f32.mrf.mxu3 }
 0x25a   :  { %2139 = vst [vmem:[#allocation11 + $0x10] sm:$0xff] %v2011_v7  ;;  %v2016_v61 = vadd.f32 0.5, %v1888_v31  ;;  %v1463_v16 = vpop.f32.mrf.mxu0 }
 0x25b   :  { %v1373_v32 = vadd.f32 %v1372_v29, %v1284_v8  ;;  %v1464_v21 = vadd.f32 %v1463_v16, %v3475_v40  ;;  %v1552_v30 = vpop.f32.mrf.mxu1 }
 0x25c   :  { %2144 = vst [vmem:[#allocation11 + $0x38] sm:$0xff] %v2016_v61 }
 0x25d   :  { %v2849_v62 = vpop.eup %2848  ;;  %v1635_v22 = vmul.f32 0.5, %v1373_v32  ;;  %v1553_v63 = vadd.f32 %v1552_v30, %v1464_v21 }
 0x25e   :  { %v1887_v0 = vmul.f32 0.5, %v2849_v62 }
 0x25f   :  { %v2851_v2 = vpop.eup %2850  ;;  %2852 = vtanh.f32 %v1635_v22  ;;  %v1640_v6 = vmul.f32 0.5, %v1553_v63 }
 0x260   :  { %v2015_v1 = vadd.f32 0.5, %v1887_v0  ;;  %v1892_v9 = vmul.f32 0.5, %v2851_v2  ;;  %v1285_v10 = vpop.f32.mrf.mxu2 }
 0x261   :  { %2854 = vtanh.f32 %v1640_v6  ;;  %v1286_v51 = vadd.f32 %v1285_v10, %v3481_v5  ;;  %v1374_v17 = vpop.f32.mrf.mxu3 }
 0x262   :  { %2143 = vst [vmem:[#allocation11 + $0x30] sm:$0xff] %v2015_v1  ;;  %v2020_v18 = vadd.f32 0.5, %v1892_v9  ;;  %v1466_v52 = vpop.f32.mrf.mxu0 }
 0x263   :  { %v1375_v19 = vadd.f32 %v1374_v17, %v1286_v51  ;;  %v1467_v46 = vadd.f32 %v1466_v52, %v3475_v40  ;;  %v1555_v20 = vpop.f32.mrf.mxu1 }
 0x264   :  { %2148 = vst [vmem:[#allocation11 + $0x58] sm:$0xff] %v2020_v18 }
 0x265   :  { %v2853_v25 = vpop.eup %2852  ;;  %v1639_v26 = vmul.f32 0.5, %v1375_v19  ;;  %v1556_v27 = vadd.f32 %v1555_v20, %v1467_v46  ;;  %1327 = vmatmul.bf16.gmra.mxu2 %v3240_v56  ;;  %1505 = vmatmul.bf16.gmra.mxu0 %v3240_v56 }
 0x266   :  { %v1891_v47 = vmul.f32 0.5, %v2853_v25  ;;  %1416 = vmatmul.bf16.gmra.mxu3 %v3242_v57  ;;  %1594 = vmatmul.bf16.gmra.mxu1 %v3242_v57 }
 0x267   :  { %v2855_v28 = vpop.eup %2854  ;;  %2856 = vtanh.f32 %v1639_v26  ;;  %v1644_v59 = vmul.f32 0.5, %v1556_v27 }
 0x268   :  { %v2019_v33 = vadd.f32 0.5, %v1891_v47  ;;  %v1896_v34 = vmul.f32 0.5, %v2855_v28  ;;  %v1288_v60 = vpop.f32.mrf.mxu2 }
 0x269   :  { %2858 = vtanh.f32 %v1644_v59  ;;  %v1289_v35 = vadd.f32 %v1288_v60, %v3481_v5  ;;  %v1377_v36 = vpop.f32.mrf.mxu3 }
 0x26a   :  { %2147 = vst [vmem:[#allocation11 + $0x50] sm:$0xff] %v2019_v33  ;;  %v2024_v41 = vadd.f32 0.5, %v1896_v34  ;;  %v1468_v42 = vpop.f32.mrf.mxu0 }
 0x26b   :  { %v1378_v23 = vadd.f32 %v1377_v36, %v1289_v35  ;;  %v1469_v56 = vadd.f32 %v1468_v42, %v3475_v40  ;;  %v1557_v15 = vpop.f32.mrf.mxu1 }
 0x26c   :  { %2152 = vst [vmem:[#allocation11 + $0x78] sm:$0xff] %v2024_v41 }
 0x26d   :  { %v2857_v11 = vpop.eup %2856  ;;  %v1643_v57 = vmul.f32 0.5, %v1378_v23  ;;  %v1558_v45 = vadd.f32 %v1557_v15, %v1469_v56 }
 0x26e   :  { %v1895_v24 = vmul.f32 0.5, %v2857_v11 }
 0x26f   :  { %v2859_v14 = vpop.eup %2858  ;;  %2860 = vtanh.f32 %v1643_v57  ;;  %v1648_v48 = vmul.f32 0.5, %v1558_v45 }
 0x270   :  { %v2023_v53 = vadd.f32 0.5, %v1895_v24  ;;  %v1900_v39 = vmul.f32 0.5, %v2859_v14  ;;  %v1290_v54 = vpop.f32.mrf.mxu2 }
 0x271   :  { %2862 = vtanh.f32 %v1648_v48  ;;  %v1291_v55 = vadd.f32 %v1290_v54, %v3481_v5  ;;  %v1379_v7 = vpop.f32.mrf.mxu3 }
 0x272   :  { %2151 = vst [vmem:[#allocation11 + $0x70] sm:$0xff] %v2023_v53  ;;  %v2028_v31 = vadd.f32 0.5, %v1900_v39  ;;  %v1471_v58 = vpop.f32.mrf.mxu0 }
 0x273   :  { %v1380_v8 = vadd.f32 %v1379_v7, %v1291_v55  ;;  %v1472_v29 = vadd.f32 %v1471_v58, %v3475_v40  ;;  %v1560_v61 = vpop.f32.mrf.mxu1 }
 0x274   :  { %2156 = vst [vmem:[#allocation11 + $0x98] sm:$0xff] %v2028_v31 }
 0x275   :  { %v2861_v16 = vpop.eup %2860  ;;  %v1647_v32 = vmul.f32 0.5, %v1380_v8  ;;  %v1561_v21 = vadd.f32 %v1560_v61, %v1472_v29  ;;  %1332 = vmatmul.bf16.gmra.mxu2 %v3260_v37  ;;  %1510 = vmatmul.bf16.gmra.mxu0 %v3260_v37 }
 0x276   :  { %v1899_v30 = vmul.f32 0.5, %v2861_v16  ;;  %1421 = vmatmul.bf16.gmra.mxu3 %v3262_v38  ;;  %1599 = vmatmul.bf16.gmra.mxu1 %v3262_v38 }
 0x277   :  { %v2863_v62 = vpop.eup %2862  ;;  %2864 = vtanh.f32 %v1647_v32  ;;  %v1652_v22 = vmul.f32 0.5, %v1561_v21 }
 0x278   :  { %v2027_v63 = vadd.f32 0.5, %v1899_v30  ;;  %v1904_v0 = vmul.f32 0.5, %v2863_v62  ;;  %v1293_v2 = vpop.f32.mrf.mxu2 }
 0x279   :  { %2866 = vtanh.f32 %v1652_v22  ;;  %v1294_v6 = vadd.f32 %v1293_v2, %v3481_v5  ;;  %v1382_v1 = vpop.f32.mrf.mxu3 }
 0x27a   :  { %2155 = vst [vmem:[#allocation11 + $0x90] sm:$0xff] %v2027_v63  ;;  %v2032_v9 = vadd.f32 0.5, %v1904_v0  ;;  %v1473_v10 = vpop.f32.mrf.mxu0 }
 0x27b   :  { %v1383_v51 = vadd.f32 %v1382_v1, %v1294_v6  ;;  %v1474_v37 = vadd.f32 %v1473_v10, %v3475_v40  ;;  %v1562_v17 = vpop.f32.mrf.mxu1 }
 0x27c   :  { %2160 = vst [vmem:[#allocation11 + $0xb8] sm:$0xff] %v2032_v9 }
 0x27d   :  { %v2865_v18 = vpop.eup %2864  ;;  %v1651_v38 = vmul.f32 0.5, %v1383_v51  ;;  %v1563_v52 = vadd.f32 %v1562_v17, %v1474_v37 }
 0x27e   :  { %v1903_v19 = vmul.f32 0.5, %v2865_v18 }
 0x27f   :  { %v2867_v46 = vpop.eup %2866  ;;  %2868 = vtanh.f32 %v1651_v38  ;;  %v1656_v20 = vmul.f32 0.5, %v1563_v52 }
 0x280   :  { %v2031_v25 = vadd.f32 0.5, %v1903_v19  ;;  %v1908_v26 = vmul.f32 0.5, %v2867_v46  ;;  %v1295_v27 = vpop.f32.mrf.mxu2 }
 0x281   :  { %2870 = vtanh.f32 %v1656_v20  ;;  %v1296_v47 = vadd.f32 %v1295_v27, %v3481_v5  ;;  %v1384_v28 = vpop.f32.mrf.mxu3 }
 0x282   :  { %2159 = vst [vmem:[#allocation11 + $0xb0] sm:$0xff] %v2031_v25  ;;  %v2036_v59 = vadd.f32 0.5, %v1908_v26  ;;  %v1476_v33 = vpop.f32.mrf.mxu0 }
 0x283   :  { %v1385_v34 = vadd.f32 %v1384_v28, %v1296_v47  ;;  %v1477_v60 = vadd.f32 %v1476_v33, %v3475_v40  ;;  %v1565_v35 = vpop.f32.mrf.mxu1 }
 0x284   :  { %2164 = vst [vmem:[#allocation11 + $0xd8] sm:$0xff] %v2036_v59 }
 0x285   :  { %v2869_v36 = vpop.eup %2868  ;;  %v1655_v41 = vmul.f32 0.5, %v1385_v34  ;;  %v1566_v42 = vadd.f32 %v1565_v35, %v1477_v60  ;;  %1337 = vmatmul.bf16.gmra.mxu2 %v3280_v12  ;;  %1515 = vmatmul.bf16.gmra.mxu0 %v3280_v12 }
 0x286   :  { %v1907_v23 = vmul.f32 0.5, %v2869_v36  ;;  %1426 = vmatmul.bf16.gmra.mxu3 %v3282_v13  ;;  %1604 = vmatmul.bf16.gmra.mxu1 %v3282_v13 }
 0x287   :  { %v2871_v56 = vpop.eup %2870  ;;  %2872 = vtanh.f32 %v1655_v41  ;;  %v1660_v15 = vmul.f32 0.5, %v1566_v42 }
 0x288   :  { %v2035_v11 = vadd.f32 0.5, %v1907_v23  ;;  %v1912_v57 = vmul.f32 0.5, %v2871_v56  ;;  %v1298_v45 = vpop.f32.mrf.mxu2 }
 0x289   :  { %2874 = vtanh.f32 %v1660_v15  ;;  %v1299_v24 = vadd.f32 %v1298_v45, %v3481_v5  ;;  %v1387_v14 = vpop.f32.mrf.mxu3 }
 0x28a   :  { %2163 = vst [vmem:[#allocation11 + $0xd0] sm:$0xff] %v2035_v11  ;;  %v2040_v48 = vadd.f32 0.5, %v1912_v57  ;;  %v1478_v53 = vpop.f32.mrf.mxu0 }
 0x28b   :  { %v1388_v39 = vadd.f32 %v1387_v14, %v1299_v24  ;;  %v1479_v12 = vadd.f32 %v1478_v53, %v3475_v40  ;;  %v1567_v54 = vpop.f32.mrf.mxu1 }
 0x28c   :  { %2168 = vst [vmem:[#allocation11 + $0xf8] sm:$0xff] %v2040_v48 }
 0x28d   :  { %v2873_v55 = vpop.eup %2872  ;;  %v1659_v13 = vmul.f32 0.5, %v1388_v39  ;;  %v1568_v7 = vadd.f32 %v1567_v54, %v1479_v12 }
 0x28e   :  { %v1911_v31 = vmul.f32 0.5, %v2873_v55 }
 0x28f   :  { %v2875_v58 = vpop.eup %2874  ;;  %2876 = vtanh.f32 %v1659_v13  ;;  %v1664_v8 = vmul.f32 0.5, %v1568_v7 }
 0x290   :  { %v2039_v29 = vadd.f32 0.5, %v1911_v31  ;;  %v1916_v61 = vmul.f32 0.5, %v2875_v58  ;;  %v1300_v16 = vpop.f32.mrf.mxu2 }
 0x291   :  { %2878 = vtanh.f32 %v1664_v8  ;;  %v1301_v32 = vadd.f32 %v1300_v16, %v3481_v5  ;;  %v1389_v21 = vpop.f32.mrf.mxu3 }
 0x292   :  { %2167 = vst [vmem:[#allocation11 + $0xf0] sm:$0xff] %v2039_v29  ;;  %v2044_v30 = vadd.f32 0.5, %v1916_v61  ;;  %v1481_v62 = vpop.f32.mrf.mxu0 }
 0x293   :  { %v1390_v22 = vadd.f32 %v1389_v21, %v1301_v32  ;;  %v1482_v63 = vadd.f32 %v1481_v62, %v3475_v40  ;;  %v1570_v0 = vpop.f32.mrf.mxu1 }
 0x294   :  { %2172 = vst [vmem:[#allocation11 + $0x118] sm:$0xff] %v2044_v30 }
 0x295   :  { %v2877_v2 = vpop.eup %2876  ;;  %v1663_v6 = vmul.f32 0.5, %v1390_v22  ;;  %v1571_v1 = vadd.f32 %v1570_v0, %v1482_v63  ;;  %1342 = vmatmul.bf16.gmra.mxu2 %v3300_v3  ;;  %1520 = vmatmul.bf16.gmra.mxu0 %v3300_v3 }
 0x296   :  { %v1915_v9 = vmul.f32 0.5, %v2877_v2  ;;  %1431 = vmatmul.bf16.gmra.mxu3 %v3302_v4  ;;  %1609 = vmatmul.bf16.gmra.mxu1 %v3302_v4 }
 0x297   :  { %v2879_v10 = vpop.eup %2878  ;;  %2880 = vtanh.f32 %v1663_v6  ;;  %v1668_v51 = vmul.f32 0.5, %v1571_v1 }
 0x298   :  { %v2043_v37 = vadd.f32 0.5, %v1915_v9  ;;  %v1920_v17 = vmul.f32 0.5, %v2879_v10  ;;  %v1303_v18 = vpop.f32.mrf.mxu2 }
 0x299   :  { %2882 = vtanh.f32 %v1668_v51  ;;  %v1304_v38 = vadd.f32 %v1303_v18, %v3481_v5  ;;  %v1392_v52 = vpop.f32.mrf.mxu3 }
 0x29a   :  { %2171 = vst [vmem:[#allocation11 + $0x110] sm:$0xff] %v2043_v37  ;;  %v2048_v19 = vadd.f32 0.5, %v1920_v17  ;;  %v1483_v46 = vpop.f32.mrf.mxu0 }
 0x29b   :  { %v1393_v20 = vadd.f32 %v1392_v52, %v1304_v38  ;;  %v1484_v3 = vadd.f32 %v1483_v46, %v3475_v40  ;;  %v1572_v25 = vpop.f32.mrf.mxu1 }
 0x29c   :  { %2176 = vst [vmem:[#allocation11 + $0x138] sm:$0xff] %v2048_v19 }
 0x29d   :  { %v2881_v26 = vpop.eup %2880  ;;  %v1667_v4 = vmul.f32 0.5, %v1393_v20  ;;  %v1573_v27 = vadd.f32 %v1572_v25, %v1484_v3 }
 0x29e   :  { %v1919_v47 = vmul.f32 0.5, %v2881_v26 }
 0x29f   :  { %v2883_v28 = vpop.eup %2882  ;;  %2884 = vtanh.f32 %v1667_v4  ;;  %v1672_v59 = vmul.f32 0.5, %v1573_v27 }
 0x2a0   :  { %v2047_v33 = vadd.f32 0.5, %v1919_v47  ;;  %v1924_v34 = vmul.f32 0.5, %v2883_v28  ;;  %v1305_v60 = vpop.f32.mrf.mxu2 }
 0x2a1   :  { %2886 = vtanh.f32 %v1672_v59  ;;  %v1306_v35 = vadd.f32 %v1305_v60, %v3481_v5  ;;  %v1394_v36 = vpop.f32.mrf.mxu3 }
 0x2a2   :  { %2175 = vst [vmem:[#allocation11 + $0x130] sm:$0xff] %v2047_v33  ;;  %v2052_v41 = vadd.f32 0.5, %v1924_v34  ;;  %v1486_v42 = vpop.f32.mrf.mxu0 }
 0x2a3   :  { %v1395_v23 = vadd.f32 %v1394_v36, %v1306_v35  ;;  %v1487_v56 = vadd.f32 %v1486_v42, %v3475_v40  ;;  %v1575_v15 = vpop.f32.mrf.mxu1 }
 0x2a4   :  { %2180 = vst [vmem:[#allocation11 + $0x158] sm:$0xff] %v2052_v41 }
 0x2a5   :  { %v2885_v11 = vpop.eup %2884  ;;  %v1671_v57 = vmul.f32 0.5, %v1395_v23  ;;  %v1576_v45 = vadd.f32 %v1575_v15, %v1487_v56  ;;  %1347 = vmatmul.bf16.gmra.mxu2 %v3320_v49  ;;  %1525 = vmatmul.bf16.gmra.mxu0 %v3320_v49 }
 0x2a6   :  { %v1923_v24 = vmul.f32 0.5, %v2885_v11  ;;  %1436 = vmatmul.bf16.gmra.mxu3 %v3322_v50  ;;  %1614 = vmatmul.bf16.gmra.mxu1 %v3322_v50 }
 0x2a7   :  { %v2887_v14 = vpop.eup %2886  ;;  %2888 = vtanh.f32 %v1671_v57  ;;  %v1676_v48 = vmul.f32 0.5, %v1576_v45 }
 0x2a8   :  { %v2051_v53 = vadd.f32 0.5, %v1923_v24  ;;  %v1928_v39 = vmul.f32 0.5, %v2887_v14  ;;  %v1308_v12 = vpop.f32.mrf.mxu2 }
 0x2a9   :  { %2890 = vtanh.f32 %v1676_v48  ;;  %v1309_v54 = vadd.f32 %v1308_v12, %v3481_v5  ;;  %v1397_v55 = vpop.f32.mrf.mxu3 }
 0x2aa   :  { %2179 = vst [vmem:[#allocation11 + $0x150] sm:$0xff] %v2051_v53  ;;  %v2056_v13 = vadd.f32 0.5, %v1928_v39  ;;  %v1488_v7 = vpop.f32.mrf.mxu0 }
 0x2ab   :  { %v1398_v31 = vadd.f32 %v1397_v55, %v1309_v54  ;;  %v1489_v49 = vadd.f32 %v1488_v7, %v3475_v40  ;;  %v1577_v58 = vpop.f32.mrf.mxu1 }
 0x2ac   :  { %2184 = vst [vmem:[#allocation11 + $0x178] sm:$0xff] %v2056_v13 }
 0x2ad   :  { %v2889_v8 = vpop.eup %2888  ;;  %v1675_v50 = vmul.f32 0.5, %v1398_v31  ;;  %v1578_v29 = vadd.f32 %v1577_v58, %v1489_v49 }
 0x2ae   :  { %v1927_v61 = vmul.f32 0.5, %v2889_v8 }
 0x2af   :  { %v2891_v16 = vpop.eup %2890  ;;  %2892 = vtanh.f32 %v1675_v50  ;;  %v1680_v32 = vmul.f32 0.5, %v1578_v29 }
 0x2b0   :  { %v2055_v21 = vadd.f32 0.5, %v1927_v61  ;;  %v1932_v30 = vmul.f32 0.5, %v2891_v16  ;;  %v1310_v62 = vpop.f32.mrf.mxu2 }
 0x2b1   :  { %2894 = vtanh.f32 %v1680_v32  ;;  %v1311_v22 = vadd.f32 %v1310_v62, %v3481_v5  ;;  %v1399_v63 = vpop.f32.mrf.mxu3 }
 0x2b2   :  { %2183 = vst [vmem:[#allocation11 + $0x170] sm:$0xff] %v2055_v21  ;;  %v2060_v0 = vadd.f32 0.5, %v1932_v30  ;;  %v1491_v2 = vpop.f32.mrf.mxu0 }
 0x2b3   :  { %v1400_v6 = vadd.f32 %v1399_v63, %v1311_v22  ;;  %v1492_v1 = vadd.f32 %v1491_v2, %v3475_v40  ;;  %v1580_v9 = vpop.f32.mrf.mxu1 }
 0x2b4   :  { %2188 = vst [vmem:[#allocation11 + $0x198] sm:$0xff] %v2060_v0 }
 0x2b5   :  { %v2893_v10 = vpop.eup %2892  ;;  %v1679_v51 = vmul.f32 0.5, %v1400_v6  ;;  %v1581_v37 = vadd.f32 %v1580_v9, %v1492_v1  ;;  %1352 = vmatmul.bf16.gmra.mxu2 %v3340_v43  ;;  %1530 = vmatmul.bf16.gmra.mxu0 %v3340_v43 }
 0x2b6   :  { %v1931_v17 = vmul.f32 0.5, %v2893_v10  ;;  %1441 = vmatmul.bf16.gmra.mxu3 %v3342_v44  ;;  %1619 = vmatmul.bf16.gmra.mxu1 %v3342_v44 }
 0x2b7   :  { %v2895_v18 = vpop.eup %2894  ;;  %2896 = vtanh.f32 %v1679_v51  ;;  %v1684_v38 = vmul.f32 0.5, %v1581_v37 }
 0x2b8   :  { %v2059_v52 = vadd.f32 0.5, %v1931_v17  ;;  %v1936_v19 = vmul.f32 0.5, %v2895_v18  ;;  %v1313_v46 = vpop.f32.mrf.mxu2 }
 0x2b9   :  { %2898 = vtanh.f32 %v1684_v38  ;;  %v1314_v20 = vadd.f32 %v1313_v46, %v3481_v5  ;;  %v1402_v3 = vpop.f32.mrf.mxu3 }
 0x2ba   :  { %2187 = vst [vmem:[#allocation11 + $0x190] sm:$0xff] %v2059_v52  ;;  %v2064_v25 = vadd.f32 0.5, %v1936_v19  ;;  %v1493_v26 = vpop.f32.mrf.mxu0 }
 0x2bb   :  { %v1403_v4 = vadd.f32 %v1402_v3, %v1314_v20  ;;  %v1494_v43 = vadd.f32 %v1493_v26, %v3475_v40  ;;  %v1582_v27 = vpop.f32.mrf.mxu1 }
 0x2bc   :  { %2192 = vst [vmem:[#allocation11 + $0x1b8] sm:$0xff] %v2064_v25 }
 0x2bd   :  { %v2897_v47 = vpop.eup %2896  ;;  %v1683_v44 = vmul.f32 0.5, %v1403_v4  ;;  %v1583_v28 = vadd.f32 %v1582_v27, %v1494_v43 }
 0x2be   :  { %v1935_v59 = vmul.f32 0.5, %v2897_v47 }
 0x2bf   :  { %v2899_v33 = vpop.eup %2898  ;;  %2900 = vtanh.f32 %v1683_v44  ;;  %v1688_v34 = vmul.f32 0.5, %v1583_v28 }
 0x2c0   :  { %v2063_v60 = vadd.f32 0.5, %v1935_v59  ;;  %v1940_v35 = vmul.f32 0.5, %v2899_v33  ;;  %v1315_v36 = vpop.f32.mrf.mxu2 }
 0x2c1   :  { %2902 = vtanh.f32 %v1688_v34  ;;  %v1316_v41 = vadd.f32 %v1315_v36, %v3481_v5  ;;  %v1404_v42 = vpop.f32.mrf.mxu3 }
 0x2c2   :  { %2191 = vst [vmem:[#allocation11 + $0x1b0] sm:$0xff] %v2063_v60  ;;  %v2068_v23 = vadd.f32 0.5, %v1940_v35  ;;  %v1496_v56 = vpop.f32.mrf.mxu0 }
 0x2c3   :  { %v1405_v15 = vadd.f32 %v1404_v42, %v1316_v41  ;;  %v1497_v11 = vadd.f32 %v1496_v56, %v3475_v40  ;;  %v1585_v57 = vpop.f32.mrf.mxu1 }
 0x2c4   :  { %2196 = vst [vmem:[#allocation11 + $0x1d8] sm:$0xff] %v2068_v23 }
 0x2c5   :  { %v2901_v45 = vpop.eup %2900  ;;  %v1687_v24 = vmul.f32 0.5, %v1405_v15  ;;  %v1586_v14 = vadd.f32 %v1585_v57, %v1497_v11 }
 0x2c6   :  { %v1939_v48 = vmul.f32 0.5, %v2901_v45 }
 0x2c7   :  { %v2903_v53 = vpop.eup %2902  ;;  %2904 = vtanh.f32 %v1687_v24  ;;  %v1692_v39 = vmul.f32 0.5, %v1586_v14 }
 0x2c8   :  { %v2067_v12 = vadd.f32 0.5, %v1939_v48  ;;  %v1944_v54 = vmul.f32 0.5, %v2903_v53  ;;  %v1318_v55 = vpop.f32.mrf.mxu2 }
 0x2c9   :  { %2906 = vtanh.f32 %v1692_v39  ;;  %v1319_v13 = vadd.f32 %v1318_v55, %v3481_v5  ;;  %v1407_v7 = vpop.f32.mrf.mxu3 }
 0x2ca   :  { %2195 = vst [vmem:[#allocation11 + $0x1d0] sm:$0xff] %v2067_v12  ;;  %v2072_v31 = vadd.f32 0.5, %v1944_v54  ;;  %v1498_v49 = vpop.f32.mrf.mxu0 }
 0x2cb   :  { %v1408_v58 = vadd.f32 %v1407_v7, %v1319_v13  ;;  %v1499_v8 = vadd.f32 %v1498_v49, %v3475_v40  ;;  %v1587_v50 = vpop.f32.mrf.mxu1 }
 0x2cc   :  { %2200 = vst [vmem:[#allocation11 + $0x1f8] sm:$0xff] %v2072_v31 }
 0x2cd   :  { %v2905_v29 = vpop.eup %2904  ;;  %v1691_v61 = vmul.f32 0.5, %v1408_v58  ;;  %v1588_v16 = vadd.f32 %v1587_v50, %v1499_v8 }
 0x2ce   :  { %v1943_v32 = vmul.f32 0.5, %v2905_v29 }
 0x2cf   :  { %v2907_v21 = vpop.eup %2906  ;;  %2908 = vtanh.f32 %v1691_v61  ;;  %v1696_v30 = vmul.f32 0.5, %v1588_v16 }
 0x2d0   :  { %v2071_v62 = vadd.f32 0.5, %v1943_v32  ;;  %v1948_v22 = vmul.f32 0.5, %v2907_v21  ;;  %v1320_v63 = vpop.f32.mrf.mxu2 }
 0x2d1   :  { %2910 = vtanh.f32 %v1696_v30  ;;  %v1321_v0 = vadd.f32 %v1320_v63, %v3481_v5  ;;  %v1409_v2 = vpop.f32.mrf.mxu3 }
 0x2d2   :  { %2199 = vst [vmem:[#allocation11 + $0x1f0] sm:$0xff] %v2071_v62  ;;  %v2076_v6 = vadd.f32 0.5, %v1948_v22  ;;  %v1501_v1 = vpop.f32.mrf.mxu0 }
 0x2d3   :  { %v1410_v9 = vadd.f32 %v1409_v2, %v1321_v0  ;;  %v1502_v10 = vadd.f32 %v1501_v1, %v3475_v40  ;;  %v1590_v51 = vpop.f32.mrf.mxu1 }
 0x2d4   :  { %2204 = vst [vmem:[#allocation11 + $0x218] sm:$0xff] %v2076_v6 }
 0x2d5   :  { %v2909_v37 = vpop.eup %2908  ;;  %v1695_v17 = vmul.f32 0.5, %v1410_v9  ;;  %v1591_v18 = vadd.f32 %v1590_v51, %v1502_v10 }
 0x2d6   :  { %v1947_v38 = vmul.f32 0.5, %v2909_v37 }
 0x2d7   :  { %v2911_v52 = vpop.eup %2910  ;;  %2912 = vtanh.f32 %v1695_v17  ;;  %v1700_v19 = vmul.f32 0.5, %v1591_v18 }
 0x2d8   :  { %v2075_v46 = vadd.f32 0.5, %v1947_v38  ;;  %v1952_v20 = vmul.f32 0.5, %v2911_v52  ;;  %v1323_v3 = vpop.f32.mrf.mxu2 }
 0x2d9   :  { %2914 = vtanh.f32 %v1700_v19  ;;  %v1324_v25 = vadd.f32 %v1323_v3, %v3481_v5  ;;  %v1412_v26 = vpop.f32.mrf.mxu3 }
 0x2da   :  { %2203 = vst [vmem:[#allocation11 + $0x210] sm:$0xff] %v2075_v46  ;;  %v2080_v4 = vadd.f32 0.5, %v1952_v20  ;;  %v1503_v43 = vpop.f32.mrf.mxu0 }
 0x2db   :  { %v1413_v27 = vadd.f32 %v1412_v26, %v1324_v25  ;;  %v1504_v47 = vadd.f32 %v1503_v43, %v3475_v40  ;;  %v1592_v44 = vpop.f32.mrf.mxu1 }
 0x2dc   :  { %2208 = vst [vmem:[#allocation11 + $0x238] sm:$0xff] %v2080_v4 }
 0x2dd   :  { %v2913_v28 = vpop.eup %2912  ;;  %v1699_v59 = vmul.f32 0.5, %v1413_v27  ;;  %v1593_v33 = vadd.f32 %v1592_v44, %v1504_v47 }
 0x2de   :  { %v1951_v34 = vmul.f32 0.5, %v2913_v28 }
 0x2df   :  { %v2915_v60 = vpop.eup %2914  ;;  %2916 = vtanh.f32 %v1699_v59  ;;  %v1704_v35 = vmul.f32 0.5, %v1593_v33 }
 0x2e0   :  { %v2079_v36 = vadd.f32 0.5, %v1951_v34  ;;  %v1956_v41 = vmul.f32 0.5, %v2915_v60  ;;  %v1325_v42 = vpop.f32.mrf.mxu2 }
 0x2e1   :  { %2918 = vtanh.f32 %v1704_v35  ;;  %v1326_v23 = vadd.f32 %v1325_v42, %v3481_v5  ;;  %v1414_v56 = vpop.f32.mrf.mxu3 }
 0x2e2   :  { %2207 = vst [vmem:[#allocation11 + $0x230] sm:$0xff] %v2079_v36  ;;  %v2084_v15 = vadd.f32 0.5, %v1956_v41  ;;  %v1506_v11 = vpop.f32.mrf.mxu0 }
 0x2e3   :  { %v1415_v57 = vadd.f32 %v1414_v56, %v1326_v23  ;;  %v1507_v45 = vadd.f32 %v1506_v11, %v3475_v40  ;;  %v1595_v24 = vpop.f32.mrf.mxu1 }
 0x2e4   :  { %2212 = vst [vmem:[#allocation11 + $0x258] sm:$0xff] %v2084_v15 }
 0x2e5   :  { %v2917_v14 = vpop.eup %2916  ;;  %v1703_v48 = vmul.f32 0.5, %v1415_v57  ;;  %v1596_v53 = vadd.f32 %v1595_v24, %v1507_v45 }
 0x2e6   :  { %v1955_v39 = vmul.f32 0.5, %v2917_v14 }
 0x2e7   :  { %v2919_v12 = vpop.eup %2918  ;;  %2920 = vtanh.f32 %v1703_v48  ;;  %v1708_v54 = vmul.f32 0.5, %v1596_v53 }
 0x2e8   :  { %v2083_v55 = vadd.f32 0.5, %v1955_v39  ;;  %v1960_v13 = vmul.f32 0.5, %v2919_v12  ;;  %v1328_v7 = vpop.f32.mrf.mxu2 }
 0x2e9   :  { %2922 = vtanh.f32 %v1708_v54  ;;  %v1329_v31 = vadd.f32 %v1328_v7, %v3481_v5  ;;  %v1417_v49 = vpop.f32.mrf.mxu3 }
 0x2ea   :  { %2211 = vst [vmem:[#allocation11 + $0x250] sm:$0xff] %v2083_v55  ;;  %v2088_v58 = vadd.f32 0.5, %v1960_v13  ;;  %v1508_v8 = vpop.f32.mrf.mxu0 }
 0x2eb   :  { %v1418_v50 = vadd.f32 %v1417_v49, %v1329_v31  ;;  %v1509_v29 = vadd.f32 %v1508_v8, %v3475_v40  ;;  %v1597_v61 = vpop.f32.mrf.mxu1 }
 0x2ec   :  { %2216 = vst [vmem:[#allocation11 + $0x278] sm:$0xff] %v2088_v58 }
 0x2ed   :  { %v2921_v16 = vpop.eup %2920  ;;  %v1707_v32 = vmul.f32 0.5, %v1418_v50  ;;  %v1598_v21 = vadd.f32 %v1597_v61, %v1509_v29 }
 0x2ee   :  { %v1959_v30 = vmul.f32 0.5, %v2921_v16 }
 0x2ef   :  { %v2923_v62 = vpop.eup %2922  ;;  %2924 = vtanh.f32 %v1707_v32  ;;  %v1712_v22 = vmul.f32 0.5, %v1598_v21 }
 0x2f0   :  { %v2087_v63 = vadd.f32 0.5, %v1959_v30  ;;  %v1964_v0 = vmul.f32 0.5, %v2923_v62  ;;  %v1330_v2 = vpop.f32.mrf.mxu2 }
 0x2f1   :  { %2926 = vtanh.f32 %v1712_v22  ;;  %v1331_v6 = vadd.f32 %v1330_v2, %v3481_v5  ;;  %v1419_v1 = vpop.f32.mrf.mxu3 }
 0x2f2   :  { %2215 = vst [vmem:[#allocation11 + $0x270] sm:$0xff] %v2087_v63  ;;  %v2092_v9 = vadd.f32 0.5, %v1964_v0  ;;  %v1511_v10 = vpop.f32.mrf.mxu0 }
 0x2f3   :  { %v1420_v51 = vadd.f32 %v1419_v1, %v1331_v6  ;;  %v1512_v37 = vadd.f32 %v1511_v10, %v3475_v40  ;;  %v1600_v17 = vpop.f32.mrf.mxu1 }
 0x2f4   :  { %2220 = vst [vmem:[#allocation11 + $0x298] sm:$0xff] %v2092_v9 }
 0x2f5   :  { %v2925_v18 = vpop.eup %2924  ;;  %v1711_v38 = vmul.f32 0.5, %v1420_v51  ;;  %v1601_v52 = vadd.f32 %v1600_v17, %v1512_v37 }
 0x2f6   :  { %v1963_v19 = vmul.f32 0.5, %v2925_v18 }
 0x2f7   :  { %v2927_v46 = vpop.eup %2926  ;;  %2928 = vtanh.f32 %v1711_v38  ;;  %v1716_v20 = vmul.f32 0.5, %v1601_v52 }
 0x2f8   :  { %v2091_v3 = vadd.f32 0.5, %v1963_v19  ;;  %v1968_v25 = vmul.f32 0.5, %v2927_v46  ;;  %v1333_v26 = vpop.f32.mrf.mxu2 }
 0x2f9   :  { %2930 = vtanh.f32 %v1716_v20  ;;  %v1334_v4 = vadd.f32 %v1333_v26, %v3481_v5  ;;  %v1422_v43 = vpop.f32.mrf.mxu3 }
 0x2fa   :  { %2219 = vst [vmem:[#allocation11 + $0x290] sm:$0xff] %v2091_v3  ;;  %v2096_v27 = vadd.f32 0.5, %v1968_v25  ;;  %v1513_v47 = vpop.f32.mrf.mxu0 }
 0x2fb   :  { %v1423_v44 = vadd.f32 %v1422_v43, %v1334_v4  ;;  %v1514_v28 = vadd.f32 %v1513_v47, %v3475_v40  ;;  %v1602_v59 = vpop.f32.mrf.mxu1 }
 0x2fc   :  { %2224 = vst [vmem:[#allocation11 + $0x2b8] sm:$0xff] %v2096_v27 }
 0x2fd   :  { %v2929_v33 = vpop.eup %2928  ;;  %v1715_v34 = vmul.f32 0.5, %v1423_v44  ;;  %v1603_v60 = vadd.f32 %v1602_v59, %v1514_v28 }
 0x2fe   :  { %v1967_v35 = vmul.f32 0.5, %v2929_v33 }
 0x2ff   :  { %v2931_v36 = vpop.eup %2930  ;;  %2932 = vtanh.f32 %v1715_v34  ;;  %v1720_v41 = vmul.f32 0.5, %v1603_v60 }
 0x300   :  { %v2095_v42 = vadd.f32 0.5, %v1967_v35  ;;  %v1972_v23 = vmul.f32 0.5, %v2931_v36  ;;  %v1335_v56 = vpop.f32.mrf.mxu2 }
 0x301   :  { %2934 = vtanh.f32 %v1720_v41  ;;  %v1336_v15 = vadd.f32 %v1335_v56, %v3481_v5  ;;  %v1424_v11 = vpop.f32.mrf.mxu3 }
 0x302   :  { %2223 = vst [vmem:[#allocation11 + $0x2b0] sm:$0xff] %v2095_v42  ;;  %v2100_v57 = vadd.f32 0.5, %v1972_v23  ;;  %v1516_v45 = vpop.f32.mrf.mxu0 }
 0x303   :  { %v1425_v24 = vadd.f32 %v1424_v11, %v1336_v15  ;;  %v1517_v14 = vadd.f32 %v1516_v45, %v3475_v40  ;;  %v1605_v48 = vpop.f32.mrf.mxu1 }
 0x304   :  { %2228 = vst [vmem:[#allocation11 + $0x2d8] sm:$0xff] %v2100_v57 }
 0x305   :  { %v2933_v53 = vpop.eup %2932  ;;  %v1719_v39 = vmul.f32 0.5, %v1425_v24  ;;  %v1606_v12 = vadd.f32 %v1605_v48, %v1517_v14 }
 0x306   :  { %v1971_v54 = vmul.f32 0.5, %v2933_v53 }
 0x307   :  { %v2935_v55 = vpop.eup %2934  ;;  %2936 = vtanh.f32 %v1719_v39  ;;  %v1724_v13 = vmul.f32 0.5, %v1606_v12 }
 0x308   :  { %v2099_v7 = vadd.f32 0.5, %v1971_v54  ;;  %v1976_v31 = vmul.f32 0.5, %v2935_v55  ;;  %v1338_v49 = vpop.f32.mrf.mxu2 }
 0x309   :  { %2938 = vtanh.f32 %v1724_v13  ;;  %v1339_v58 = vadd.f32 %v1338_v49, %v3481_v5  ;;  %v1427_v8 = vpop.f32.mrf.mxu3 }
 0x30a   :  { %2227 = vst [vmem:[#allocation11 + $0x2d0] sm:$0xff] %v2099_v7  ;;  %v2104_v50 = vadd.f32 0.5, %v1976_v31  ;;  %v1518_v29 = vpop.f32.mrf.mxu0 }
 0x30b   :  { %v1428_v61 = vadd.f32 %v1427_v8, %v1339_v58  ;;  %v1519_v16 = vadd.f32 %v1518_v29, %v3475_v40  ;;  %v1607_v32 = vpop.f32.mrf.mxu1 }
 0x30c   :  { %2232 = vst [vmem:[#allocation11 + $0x2f8] sm:$0xff] %v2104_v50 }
 0x30d   :  { %v2937_v21 = vpop.eup %2936  ;;  %v1723_v30 = vmul.f32 0.5, %v1428_v61  ;;  %v1608_v62 = vadd.f32 %v1607_v32, %v1519_v16 }
 0x30e   :  { %v1975_v22 = vmul.f32 0.5, %v2937_v21 }
 0x30f   :  { %v2939_v63 = vpop.eup %2938  ;;  %2940 = vtanh.f32 %v1723_v30  ;;  %v1728_v0 = vmul.f32 0.5, %v1608_v62 }
 0x310   :  { %v2103_v2 = vadd.f32 0.5, %v1975_v22  ;;  %v1980_v6 = vmul.f32 0.5, %v2939_v63  ;;  %v1340_v1 = vpop.f32.mrf.mxu2 }
 0x311   :  { %2942 = vtanh.f32 %v1728_v0  ;;  %v1341_v9 = vadd.f32 %v1340_v1, %v3481_v5  ;;  %v1429_v10 = vpop.f32.mrf.mxu3 }
 0x312   :  { %2231 = vst [vmem:[#allocation11 + $0x2f0] sm:$0xff] %v2103_v2  ;;  %v2108_v51 = vadd.f32 0.5, %v1980_v6  ;;  %v1521_v37 = vpop.f32.mrf.mxu0 }
 0x313   :  { %v1430_v17 = vadd.f32 %v1429_v10, %v1341_v9  ;;  %v1522_v18 = vadd.f32 %v1521_v37, %v3475_v40  ;;  %v1610_v38 = vpop.f32.mrf.mxu1 }
 0x314   :  { %2236 = vst [vmem:[#allocation11 + $0x318] sm:$0xff] %v2108_v51 }
 0x315   :  { %v2941_v52 = vpop.eup %2940  ;;  %v1727_v19 = vmul.f32 0.5, %v1430_v17  ;;  %v1611_v46 = vadd.f32 %v1610_v38, %v1522_v18 }
 0x316   :  { %v1979_v20 = vmul.f32 0.5, %v2941_v52 }
 0x317   :  { %v2943_v3 = vpop.eup %2942  ;;  %2944 = vtanh.f32 %v1727_v19  ;;  %v1732_v25 = vmul.f32 0.5, %v1611_v46 }
 0x318   :  { %v2107_v26 = vadd.f32 0.5, %v1979_v20  ;;  %v1984_v4 = vmul.f32 0.5, %v2943_v3  ;;  %v1343_v43 = vpop.f32.mrf.mxu2 }
 0x319   :  { %2946 = vtanh.f32 %v1732_v25  ;;  %v1344_v27 = vadd.f32 %v1343_v43, %v3481_v5  ;;  %v1432_v47 = vpop.f32.mrf.mxu3 }
 0x31a   :  { %2235 = vst [vmem:[#allocation11 + $0x310] sm:$0xff] %v2107_v26  ;;  %v2112_v44 = vadd.f32 0.5, %v1984_v4  ;;  %v1523_v28 = vpop.f32.mrf.mxu0 }
 0x31b   :  { %v1433_v59 = vadd.f32 %v1432_v47, %v1344_v27  ;;  %v1524_v33 = vadd.f32 %v1523_v28, %v3475_v40  ;;  %v1612_v34 = vpop.f32.mrf.mxu1 }
 0x31c   :  { %2240 = vst [vmem:[#allocation11 + $0x338] sm:$0xff] %v2112_v44 }
 0x31d   :  { %v2945_v60 = vpop.eup %2944  ;;  %v1731_v35 = vmul.f32 0.5, %v1433_v59  ;;  %v1613_v36 = vadd.f32 %v1612_v34, %v1524_v33 }
 0x31e   :  { %v1983_v41 = vmul.f32 0.5, %v2945_v60 }
 0x31f   :  { %v2947_v42 = vpop.eup %2946  ;;  %2948 = vtanh.f32 %v1731_v35  ;;  %v1736_v23 = vmul.f32 0.5, %v1613_v36 }
 0x320   :  { %v2111_v56 = vadd.f32 0.5, %v1983_v41  ;;  %v1988_v15 = vmul.f32 0.5, %v2947_v42  ;;  %v1345_v11 = vpop.f32.mrf.mxu2 }
 0x321   :  { %2950 = vtanh.f32 %v1736_v23  ;;  %v1346_v57 = vadd.f32 %v1345_v11, %v3481_v5  ;;  %v1434_v45 = vpop.f32.mrf.mxu3 }
 0x322   :  { %2239 = vst [vmem:[#allocation11 + $0x330] sm:$0xff] %v2111_v56  ;;  %v2116_v24 = vadd.f32 0.5, %v1988_v15  ;;  %v1526_v14 = vpop.f32.mrf.mxu0 }
 0x323   :  { %v1435_v48 = vadd.f32 %v1434_v45, %v1346_v57  ;;  %v1527_v53 = vadd.f32 %v1526_v14, %v3475_v40  ;;  %v1615_v39 = vpop.f32.mrf.mxu1 }
 0x324   :  { %2244 = vst [vmem:[#allocation11 + $0x358] sm:$0xff] %v2116_v24 }
 0x325   :  { %v2949_v12 = vpop.eup %2948  ;;  %v1735_v54 = vmul.f32 0.5, %v1435_v48  ;;  %v1616_v55 = vadd.f32 %v1615_v39, %v1527_v53 }
 0x326   :  { %v1987_v13 = vmul.f32 0.5, %v2949_v12 }
 0x327   :  { %v2951_v7 = vpop.eup %2950  ;;  %2952 = vtanh.f32 %v1735_v54  ;;  %v1740_v31 = vmul.f32 0.5, %v1616_v55 }
 0x328   :  { %v2115_v49 = vadd.f32 0.5, %v1987_v13  ;;  %v1992_v58 = vmul.f32 0.5, %v2951_v7  ;;  %v1348_v8 = vpop.f32.mrf.mxu2 }
 0x329   :  { %2954 = vtanh.f32 %v1740_v31  ;;  %v1349_v50 = vadd.f32 %v1348_v8, %v3481_v5  ;;  %v1437_v29 = vpop.f32.mrf.mxu3 }
 0x32a   :  { %2243 = vst [vmem:[#allocation11 + $0x350] sm:$0xff] %v2115_v49  ;;  %v2120_v61 = vadd.f32 0.5, %v1992_v58  ;;  %v1528_v16 = vpop.f32.mrf.mxu0 }
 0x32b   :  { %v1438_v32 = vadd.f32 %v1437_v29, %v1349_v50  ;;  %v1529_v21 = vadd.f32 %v1528_v16, %v3475_v40  ;;  %v1617_v30 = vpop.f32.mrf.mxu1 }
 0x32c   :  { %2248 = vst [vmem:[#allocation11 + $0x378] sm:$0xff] %v2120_v61 }
 0x32d   :  { %v2953_v62 = vpop.eup %2952  ;;  %v1739_v22 = vmul.f32 0.5, %v1438_v32  ;;  %v1618_v63 = vadd.f32 %v1617_v30, %v1529_v21 }
 0x32e   :  { %v1991_v0 = vmul.f32 0.5, %v2953_v62 }
 0x32f   :  { %v2955_v2 = vpop.eup %2954  ;;  %2956 = vtanh.f32 %v1739_v22  ;;  %v1744_v6 = vmul.f32 0.5, %v1618_v63 }
 0x330   :  { %v2119_v1 = vadd.f32 0.5, %v1991_v0  ;;  %v1996_v9 = vmul.f32 0.5, %v2955_v2  ;;  %v1350_v10 = vpop.f32.mrf.mxu2 }
 0x331   :  { %2958 = vtanh.f32 %v1744_v6  ;;  %v1351_v51 = vadd.f32 %v1350_v10, %v3481_v5  ;;  %v1439_v37 = vpop.f32.mrf.mxu3 }
 0x332   :  { %2247 = vst [vmem:[#allocation11 + $0x370] sm:$0xff] %v2119_v1  ;;  %v2124_v17 = vadd.f32 0.5, %v1996_v9  ;;  %v1531_v18 = vpop.f32.mrf.mxu0 }
 0x333   :  { %v1440_v38 = vadd.f32 %v1439_v37, %v1351_v51  ;;  %v1532_v52 = vadd.f32 %v1531_v18, %v3475_v40  ;;  %v1620_v19 = vpop.f32.mrf.mxu1 }
 0x334   :  { %2252 = vst [vmem:[#allocation11 + $0x398] sm:$0xff] %v2124_v17 }
 0x335   :  { %v2957_v46 = vpop.eup %2956  ;;  %v1743_v20 = vmul.f32 0.5, %v1440_v38  ;;  %v1621_v3 = vadd.f32 %v1620_v19, %v1532_v52 }
 0x336   :  { %v1995_v25 = vmul.f32 0.5, %v2957_v46 }
 0x337   :  { %v2959_v26 = vpop.eup %2958  ;;  %2960 = vtanh.f32 %v1743_v20  ;;  %v1748_v4 = vmul.f32 0.5, %v1621_v3 }
 0x338   :  { %v2123_v43 = vadd.f32 0.5, %v1995_v25  ;;  %v2000_v27 = vmul.f32 0.5, %v2959_v26  ;;  %v1353_v47 = vpop.f32.mrf.mxu2 }
 0x339   :  { %2962 = vtanh.f32 %v1748_v4  ;;  %v1354_v44 = vadd.f32 %v1353_v47, %v3481_v5  ;;  %v1442_v28 = vpop.f32.mrf.mxu3 }
 0x33a   :  { %2251 = vst [vmem:[#allocation11 + $0x390] sm:$0xff] %v2123_v43  ;;  %v2128_v59 = vadd.f32 0.5, %v2000_v27  ;;  %v1533_v33 = vpop.f32.mrf.mxu0 }
 0x33b   :  { %v1443_v34 = vadd.f32 %v1442_v28, %v1354_v44  ;;  %v1534_v60 = vadd.f32 %v1533_v33, %v3475_v40  ;;  %v1622_v35 = vpop.f32.mrf.mxu1 }
 0x33c   :  { %2256 = vst [vmem:[#allocation11 + $0x3b8] sm:$0xff] %v2128_v59 }
 0x33d   :  { %v2961_v36 = vpop.eup %2960  ;;  %v1747_v41 = vmul.f32 0.5, %v1443_v34  ;;  %v1623_v42 = vadd.f32 %v1622_v35, %v1534_v60 }
 0x33e   :  { %v1999_v23 = vmul.f32 0.5, %v2961_v36 }
 0x33f   :  { %v2963_v56 = vpop.eup %2962  ;;  %2964 = vtanh.f32 %v1747_v41  ;;  %v1752_v15 = vmul.f32 0.5, %v1623_v42 }
 0x340   :  { %v2127_v11 = vadd.f32 0.5, %v1999_v23  ;;  %v2004_v57 = vmul.f32 0.5, %v2963_v56  ;;  %v1355_v45 = vpop.f32.mrf.mxu2 }
 0x341   :  { %2966 = vtanh.f32 %v1752_v15  ;;  %v1356_v24 = vadd.f32 %v1355_v45, %v3481_v5  ;;  %v1444_v48 = vpop.f32.mrf.mxu3 }
 0x342   :  { %2255 = vst [vmem:[#allocation11 + $0x3b0] sm:$0xff] %v2127_v11  ;;  %v2132_v14 = vadd.f32 0.5, %v2004_v57 }
 0x343   :  { %v1445_v53 = vadd.f32 %v1444_v48, %v1356_v24 }
 0x344   :  { %2260 = vst [vmem:[#allocation11 + $0x3d8] sm:$0xff] %v2132_v14 }
 0x345   :  { %v2965_v40 = vpop.eup %2964  ;;  %v1751_v39 = vmul.f32 0.5, %v1445_v53 }
 0x346   :  { %v2003_v12 = vmul.f32 0.5, %v2965_v40 }
 0x347   :  { %v2967_v54 = vpop.eup %2966  ;;  %2968 = vtanh.f32 %v1751_v39 }
 0x348   :  { %v2131_v55 = vadd.f32 0.5, %v2003_v12  ;;  %v2008_v13 = vmul.f32 0.5, %v2967_v54 }
 0x34a   :  { %2259 = vst [vmem:[#allocation11 + $0x3d0] sm:$0xff] %v2131_v55  ;;  %v2136_v7 = vadd.f32 0.5, %v2008_v13 }
 0x34c   :  { %2264 = vst [vmem:[#allocation11 + $0x3f8] sm:$0xff] %v2136_v7 }
 0x34d   :  { %v2969_v5 = vpop.eup %2968 }
 0x34e   :  { %v2007_v31 = vmul.f32 0.5, %v2969_v5 }
 0x350   :  { %v2135_v49 = vadd.f32 0.5, %v2007_v31 }
 0x352   :  { %2263 = vst [vmem:[#allocation11 + $0x3f0] sm:$0xff] %v2135_v49 }
 0x353   :  { %2277 = dma.vmem_to_hbm [thread:$0]  %s2270_s4, 16384, %s2272_s21, [#allocation4], %s3133_s22, %s3133_s22, %s3134_s23  }
 0x354   :  { %3121 = dma.done.wait [#allocation4], 16384  }
 0x355   :  { %3122 = vsyncadd [#allocation4], 4294950912 }
 0x356   :  { %2282 = vsyncpa [#allocation3], 1 }
 0x357   :  { %2283 = vsyncpa [#allocation6], 1 }
 0x358   :  { %2284 = vsyncpa [#allocation9], 1 }
 0x359   :  { %2285 = vsyncpa [#allocation4], 1 }

</bundles_post_ra>
